<compile_context>
chip_gen: v7x
topology: tpu7x:2x2x1
jax: 0.10.0
libtpu: 0.0.40
codegen_flags: <defaults>
</compile_context>

<pallas_src>
import math
import numpy as np

import jax
import jax.numpy as jnp
from jax.experimental import pallas as pl
from jax.experimental.pallas import tpu as pltpu

WINDOW_SIZE = 11
SIGMA = 1.5
PAD = WINDOW_SIZE // 2
C1 = 0.01 ** 2
C2 = 0.03 ** 2


def _gaussian_1d(window_size: int, sigma: float) -> np.ndarray:
    g = np.array(
        [math.exp(-((x - window_size // 2) ** 2) / float(2 * sigma ** 2))
         for x in range(window_size)],
        dtype=np.float64,
    )
    return (g / g.sum()).astype(np.float32)


# Same weights as create_window(11, C): the 2D window is the rank-1 outer product of this
# 1D Gaussian, so the depthwise conv is exactly separable.
_W1D = _gaussian_1d(WINDOW_SIZE, SIGMA)


def _banded_conv_matrix(n: int) -> np.ndarray:
    """K[i_in, j_out] = w1d[i_in - j_out + PAD] (taps falling outside [0, n) dropped).

    Right-multiplying a (..., n) array by K applies the zero-padded 11-tap Gaussian
    along the last axis — identical to F.conv2d's zero padding for that axis.
    """
    K = np.zeros((n, n), dtype=np.float32)
    for j in range(n):                 # output position
        for t in range(WINDOW_SIZE):   # tap
            i = j + t - PAD            # input position
            if 0 <= i < n:
                K[i, j] = _W1D[t]
    return K


def _ssim_kernel(img1_ref, img2_ref, kh_ref, kw_ref, out_ref):
    # img1_ref / img2_ref: (bc_tile, H, W) f32 blocks of the flattened (B*C, H, W) images.
    a = img1_ref[...]
    b = img2_ref[...]
    bc, H, W = a.shape
    kw = kw_ref[...]                                    # (W_in, W_out)
    # Hoisted once (JAX does not CSE broadcast_in_dim): batched Kh for the H-axis
    # matmul, reused by all five conv channels.
    khb = jnp.broadcast_to(kh_ref[...][None, :, :], (bc, H, H))   # (bc, H_out, H_in)

    def gconv(x):
        # Lane-axis (W) Gaussian conv: single MXU matmul, zero padding baked into kw.
        t = jnp.dot(x.reshape(bc * H, W), kw,
                    preferred_element_type=jnp.float32,
                    precision=jax.lax.Precision.HIGHEST)
        # Sublane-axis (H) Gaussian conv: batched MXU matmul Kh @ t[b].
        return jax.lax.dot_general(
            khb, t.reshape(bc, H, W),
            dimension_numbers=(((2,), (1,)), ((0,), (0,))),
            preferred_element_type=jnp.float32,
            precision=jax.lax.Precision.HIGHEST)

    # Channel-at-a-time to keep the live set small (a, b, mu terms + one conv in flight).
    mu1 = gconv(a)
    mu2 = gconv(b)
    mu1_sq = mu1 * mu1
    mu2_sq = mu2 * mu2
    mu1_mu2 = mu1 * mu2
    sigma1_sq = gconv(a * a) - mu1_sq
    sigma2_sq = gconv(b * b) - mu2_sq
    sigma12 = gconv(a * b) - mu1_mu2

    num = (2.0 * mu1_mu2 + C1) * (2.0 * sigma12 + C2)
    den = (mu1_sq + mu2_sq + C1) * (sigma1_sq + sigma2_sq + C2)
    ssim_map = num / den

    # Per-block f32 partial sum; the global mean is finished in the wrapper.
    out_ref[...] = jnp.sum(ssim_map).reshape(1, 1, 1)


def _pick_bc_tile(BC: int, H: int, W: int, budget_bytes: int) -> int:
    """Largest divisor of BC (<= 8) whose per-step VMEM footprint fits the budget."""
    best = 1
    for t in range(1, min(BC, 8) + 1):
        if BC % t != 0:
            continue
        footprint = (14 * t * H * W + (t + 2) * max(H, W) ** 2) * 4
        if footprint <= budget_bytes:
            best = t
    return best


def ssim_pallas(img1: jax.Array, img2: jax.Array, *,
                bc_tile: int | None = None,
                vmem_budget_bytes: int = 8 * 1024 * 1024) -> jax.Array:
    """SSIM.forward(img1, img2) with window_size=11, size_average=True.

    img1, img2: (B, C, H, W) float32 (PyTorch NCHW). Returns a scalar float32.
    """
    B, C, H, W = img1.shape
    BC = B * C
    x1 = img1.astype(jnp.float32).reshape(BC, H, W)
    x2 = img2.astype(jnp.float32).reshape(BC, H, W)

    kh = jnp.asarray(_banded_conv_matrix(H).T)    # (H_out, H_in)
    kw = jnp.asarray(_banded_conv_matrix(W))      # (W_in, W_out)

    if bc_tile is None:
        bc_tile = _pick_bc_tile(BC, H, W, vmem_budget_bytes)
    assert BC % bc_tile == 0, (BC, bc_tile)
    G = BC // bc_tile
    # TODO(synk): for very large H*W where even bc_tile=1 exceeds the budget, also tile
    # rows with a +2*PAD halo; not needed at these sizes.

    footprint = (14 * bc_tile * H * W + (bc_tile + 2) * max(H, W) ** 2) * 4
    vmem_limit = int(min(64 * 1024 * 1024, max(8 * 1024 * 1024, 2 * footprint)))

    flops = int(10 * BC * H * W * (H + W) + 20 * BC * H * W)
    bytes_accessed = int(2 * BC * H * W * 4 + G * (H * H + W * W) * 4 + G * 4)

    partial = pl.pallas_call(
        _ssim_kernel,
        out_shape=jax.ShapeDtypeStruct((G, 1, 1), jnp.float32),
        grid=(G,),
        in_specs=[
            pl.BlockSpec((bc_tile, H, W), lambda i: (i, 0, 0)),
            pl.BlockSpec((bc_tile, H, W), lambda i: (i, 0, 0)),
            pl.BlockSpec((H, H), lambda i: (0, 0)),
            pl.BlockSpec((W, W), lambda i: (0, 0)),
        ],
        out_specs=pl.BlockSpec((1, 1, 1), lambda i: (i, 0, 0)),
        compiler_params=pltpu.CompilerParams(
            dimension_semantics=("parallel",),
            vmem_limit_bytes=vmem_limit,
        ),
        cost_estimate=pl.CostEstimate(
            flops=flops, transcendentals=0, bytes_accessed=bytes_accessed),
    )(x1, x2, kh, kw)

    # size_average=True -> global mean over (B, C, H, W).
    # TODO(synk): size_average=False (per-sample mean) not wired up; module default is True.
    return jnp.sum(partial) / jnp.float32(BC * H * W)


def _ssim_reference_np(img1, img2) -> float:
    """Independent float64 numpy reference mirroring the PyTorch _ssim exactly."""
    x1 = np.asarray(jax.device_get(img1), dtype=np.float64)
    x2 = np.asarray(jax.device_get(img2), dtype=np.float64)
    _, _, H, W = x1.shape
    w2d = np.outer(_W1D, _W1D).astype(np.float64)

    def dwconv(x):
        xp = np.pad(x, ((0, 0), (0, 0), (PAD, PAD), (PAD, PAD)))
        out = np.zeros_like(x)
        for i in range(WINDOW_SIZE):
            for j in range(WINDOW_SIZE):
                out += w2d[i, j] * xp[:, :, i:i + H, j:j + W]
        return out

    mu1 = dwconv(x1)
    mu2 = dwconv(x2)
    mu1_sq, mu2_sq, mu1_mu2 = mu1 * mu1, mu2 * mu2, mu1 * mu2
    sigma1_sq = dwconv(x1 * x1) - mu1_sq
    sigma2_sq = dwconv(x2 * x2) - mu2_sq
    sigma12 = dwconv(x1 * x2) - mu1_mu2
    ssim_map = ((2 * mu1_mu2 + C1) * (2 * sigma12 + C2)) / (
        (mu1_sq + mu2_sq + C1) * (sigma1_sq + sigma2_sq + C2))
    return float(ssim_map.mean())


if __name__ == "__main__":
    key = jax.random.PRNGKey(0)
    k1, k2 = jax.random.split(key)
    B, Cn, H, W = 2, 4, 16, 16
    # image-like inputs in [0, 1]
    img1 = jax.nn.sigmoid(jax.random.normal(k1, (B, Cn, H, W), dtype=jnp.float32))
    img2 = jax.nn.sigmoid(jax.random.normal(k2, (B, Cn, H, W), dtype=jnp.float32))

    # bc_tile=2 -> grid=(4,): exercises the pipelined, "parallel"-annotated grid path.
    out = jax.block_until_ready(ssim_pallas(img1, img2, bc_tile=2))
    ref = _ssim_reference_np(img1, img2)

    assert out.shape == (), f"expected scalar, got {out.shape}"
    assert abs(float(out) - ref) < 1e-4, (float(out), ref)
    print("KERNEL_OK")
</pallas_src>

<mosaic_0001>
module attributes {stable_mosaic.version = 11 : i64} {
  func.func @_ssim_kernel(%arg0: i32, %arg1: memref<2x16x16xf32, #tpu.memory_space<vmem>>, %arg2: memref<2x16x16xf32, #tpu.memory_space<vmem>>, %arg3: memref<16x16xf32, #tpu.memory_space<vmem>>, %arg4: memref<16x16xf32, #tpu.memory_space<vmem>>, %arg5: memref<1x1x1xf32, #tpu.memory_space<vmem>>) attributes {dimension_semantics = [#tpu.dimension_semantics<parallel>], iteration_bounds = array<i64: 4>, scalar_prefetch = 0 : i64, scratch_operands = 0 : i64, tpu.core_type = #tpu.core_type<tc>, window_params = [{transform_indices = @transform_0, window_bounds = array<i64: 2, 16, 16>}, {transform_indices = @transform_1, window_bounds = array<i64: 2, 16, 16>}, {pipeline_mode = #tpu.pipeline_mode<synchronous>, transform_indices = @transform_2, window_bounds = array<i64: 16, 16>}, {pipeline_mode = #tpu.pipeline_mode<synchronous>, transform_indices = @transform_3, window_bounds = array<i64: 16, 16>}, {transform_indices = @transform_4, window_bounds = array<i64: 1, 1, 1>}]} {
    %c0 = arith.constant 0 : index
    %c0_0 = arith.constant 0 : index
    %c0_1 = arith.constant 0 : index
    %0 = vector.load %arg1[%c0, %c0_0, %c0_1] : memref<2x16x16xf32, #tpu.memory_space<vmem>>, vector<2x16x16xf32>
    %c0_2 = arith.constant 0 : index
    %c0_3 = arith.constant 0 : index
    %c0_4 = arith.constant 0 : index
    %1 = vector.load %arg2[%c0_2, %c0_3, %c0_4] : memref<2x16x16xf32, #tpu.memory_space<vmem>>, vector<2x16x16xf32>
    %c0_5 = arith.constant 0 : index
    %c0_6 = arith.constant 0 : index
    %2 = vector.load %arg4[%c0_5, %c0_6] : memref<16x16xf32, #tpu.memory_space<vmem>>, vector<16x16xf32>
    %c0_7 = arith.constant 0 : index
    %c0_8 = arith.constant 0 : index
    %3 = vector.load %arg3[%c0_7, %c0_8] : memref<16x16xf32, #tpu.memory_space<vmem>>, vector<16x16xf32>
    %4 = vector.shape_cast %3 : vector<16x16xf32> to vector<1x16x16xf32>
    %5 = vector.shape_cast %4 : vector<1x16x16xf32> to vector<1x16x16xf32>
    %6 = vector.broadcast %5 : vector<1x16x16xf32> to vector<2x16x16xf32>
    %7 = vector.shape_cast %0 : vector<2x16x16xf32> to vector<32x16xf32>
    %cst = arith.constant dense<0.000000e+00> : vector<32x16xf32>
    %8 = tpu.matmul %7, %2, %cst {dimension_numbers = #tpu.dot_dimension_numbers<[1], [0], [0], [1], [0, 0, 1, 1], [], []>, precision = #tpu.contract_precision<fp32>} : vector<32x16xf32>, vector<16x16xf32>, vector<32x16xf32> -> vector<32x16xf32>
    %9 = vector.shape_cast %8 : vector<32x16xf32> to vector<2x16x16xf32>
    %cst_9 = arith.constant dense<0.000000e+00> : vector<2x16x16xf32>
    %10 = tpu.matmul %6, %9, %cst_9 {dimension_numbers = #tpu.dot_dimension_numbers<[2], [1], [1], [2], [0, 0, 0, 1, 1, 2], [0], [0]>, precision = #tpu.contract_precision<fp32>} : vector<2x16x16xf32>, vector<2x16x16xf32>, vector<2x16x16xf32> -> vector<2x16x16xf32>
    %11 = vector.shape_cast %1 : vector<2x16x16xf32> to vector<32x16xf32>
    %cst_10 = arith.constant dense<0.000000e+00> : vector<32x16xf32>
    %12 = tpu.matmul %11, %2, %cst_10 {dimension_numbers = #tpu.dot_dimension_numbers<[1], [0], [0], [1], [0, 0, 1, 1], [], []>, precision = #tpu.contract_precision<fp32>} : vector<32x16xf32>, vector<16x16xf32>, vector<32x16xf32> -> vector<32x16xf32>
    %13 = vector.shape_cast %12 : vector<32x16xf32> to vector<2x16x16xf32>
    %cst_11 = arith.constant dense<0.000000e+00> : vector<2x16x16xf32>
    %14 = tpu.matmul %6, %13, %cst_11 {dimension_numbers = #tpu.dot_dimension_numbers<[2], [1], [1], [2], [0, 0, 0, 1, 1, 2], [0], [0]>, precision = #tpu.contract_precision<fp32>} : vector<2x16x16xf32>, vector<2x16x16xf32>, vector<2x16x16xf32> -> vector<2x16x16xf32>
    %15 = arith.mulf %10, %10 : vector<2x16x16xf32>
    %16 = arith.mulf %14, %14 : vector<2x16x16xf32>
    %17 = arith.mulf %10, %14 : vector<2x16x16xf32>
    %18 = arith.mulf %0, %0 : vector<2x16x16xf32>
    %19 = vector.shape_cast %18 : vector<2x16x16xf32> to vector<32x16xf32>
    %cst_12 = arith.constant dense<0.000000e+00> : vector<32x16xf32>
    %20 = tpu.matmul %19, %2, %cst_12 {dimension_numbers = #tpu.dot_dimension_numbers<[1], [0], [0], [1], [0, 0, 1, 1], [], []>, precision = #tpu.contract_precision<fp32>} : vector<32x16xf32>, vector<16x16xf32>, vector<32x16xf32> -> vector<32x16xf32>
    %21 = vector.shape_cast %20 : vector<32x16xf32> to vector<2x16x16xf32>
    %cst_13 = arith.constant dense<0.000000e+00> : vector<2x16x16xf32>
    %22 = tpu.matmul %6, %21, %cst_13 {dimension_numbers = #tpu.dot_dimension_numbers<[2], [1], [1], [2], [0, 0, 0, 1, 1, 2], [0], [0]>, precision = #tpu.contract_precision<fp32>} : vector<2x16x16xf32>, vector<2x16x16xf32>, vector<2x16x16xf32> -> vector<2x16x16xf32>
    %23 = arith.subf %22, %15 : vector<2x16x16xf32>
    %24 = arith.mulf %1, %1 : vector<2x16x16xf32>
    %25 = vector.shape_cast %24 : vector<2x16x16xf32> to vector<32x16xf32>
    %cst_14 = arith.constant dense<0.000000e+00> : vector<32x16xf32>
    %26 = tpu.matmul %25, %2, %cst_14 {dimension_numbers = #tpu.dot_dimension_numbers<[1], [0], [0], [1], [0, 0, 1, 1], [], []>, precision = #tpu.contract_precision<fp32>} : vector<32x16xf32>, vector<16x16xf32>, vector<32x16xf32> -> vector<32x16xf32>
    %27 = vector.shape_cast %26 : vector<32x16xf32> to vector<2x16x16xf32>
    %cst_15 = arith.constant dense<0.000000e+00> : vector<2x16x16xf32>
    %28 = tpu.matmul %6, %27, %cst_15 {dimension_numbers = #tpu.dot_dimension_numbers<[2], [1], [1], [2], [0, 0, 0, 1, 1, 2], [0], [0]>, precision = #tpu.contract_precision<fp32>} : vector<2x16x16xf32>, vector<2x16x16xf32>, vector<2x16x16xf32> -> vector<2x16x16xf32>
    %29 = arith.subf %28, %16 : vector<2x16x16xf32>
    %30 = arith.mulf %0, %1 : vector<2x16x16xf32>
    %31 = vector.shape_cast %30 : vector<2x16x16xf32> to vector<32x16xf32>
    %cst_16 = arith.constant dense<0.000000e+00> : vector<32x16xf32>
    %32 = tpu.matmul %31, %2, %cst_16 {dimension_numbers = #tpu.dot_dimension_numbers<[1], [0], [0], [1], [0, 0, 1, 1], [], []>, precision = #tpu.contract_precision<fp32>} : vector<32x16xf32>, vector<16x16xf32>, vector<32x16xf32> -> vector<32x16xf32>
    %33 = vector.shape_cast %32 : vector<32x16xf32> to vector<2x16x16xf32>
    %cst_17 = arith.constant dense<0.000000e+00> : vector<2x16x16xf32>
    %34 = tpu.matmul %6, %33, %cst_17 {dimension_numbers = #tpu.dot_dimension_numbers<[2], [1], [1], [2], [0, 0, 0, 1, 1, 2], [0], [0]>, precision = #tpu.contract_precision<fp32>} : vector<2x16x16xf32>, vector<2x16x16xf32>, vector<2x16x16xf32> -> vector<2x16x16xf32>
    %35 = arith.subf %34, %17 : vector<2x16x16xf32>
    %cst_18 = arith.constant 2.000000e+00 : f32
    %36 = vector.broadcast %cst_18 : f32 to vector<2x16x16xf32>
    %37 = arith.mulf %36, %17 : vector<2x16x16xf32>
    %cst_19 = arith.constant 9.99999974E-5 : f32
    %38 = vector.broadcast %cst_19 : f32 to vector<2x16x16xf32>
    %39 = arith.addf %37, %38 : vector<2x16x16xf32>
    %cst_20 = arith.constant 2.000000e+00 : f32
    %40 = vector.broadcast %cst_20 : f32 to vector<2x16x16xf32>
    %41 = arith.mulf %40, %35 : vector<2x16x16xf32>
    %cst_21 = arith.constant 8.99999984E-4 : f32
    %42 = vector.broadcast %cst_21 : f32 to vector<2x16x16xf32>
    %43 = arith.addf %41, %42 : vector<2x16x16xf32>
    %44 = arith.mulf %39, %43 : vector<2x16x16xf32>
    %45 = arith.addf %15, %16 : vector<2x16x16xf32>
    %cst_22 = arith.constant 9.99999974E-5 : f32
    %46 = vector.broadcast %cst_22 : f32 to vector<2x16x16xf32>
    %47 = arith.addf %45, %46 : vector<2x16x16xf32>
    %48 = arith.addf %23, %29 : vector<2x16x16xf32>
    %cst_23 = arith.constant 8.99999984E-4 : f32
    %49 = vector.broadcast %cst_23 : f32 to vector<2x16x16xf32>
    %50 = arith.addf %48, %49 : vector<2x16x16xf32>
    %51 = arith.mulf %47, %50 : vector<2x16x16xf32>
    %52 = arith.divf %44, %51 : vector<2x16x16xf32>
    %53 = vector.shape_cast %52 : vector<2x16x16xf32> to vector<1x2x16x16xf32>
    %cst_24 = arith.constant dense<0.000000e+00> : vector<1xf32>
    %54 = vector.multi_reduction <add>, %53, %cst_24 [1, 2, 3] : vector<1x2x16x16xf32> to vector<1xf32>
    %55 = vector.shape_cast %54 : vector<1xf32> to vector<1x1x1x1xf32>
    %56 = vector.extract %55[0, 0, 0, 0] : f32 from vector<1x1x1x1xf32>
    %57 = vector.broadcast %56 : f32 to vector<1x1x1xf32>
    %c0_25 = arith.constant 0 : index
    %c0_26 = arith.constant 0 : index
    %c0_27 = arith.constant 0 : index
    %58 = vector.load %arg5[%c0_25, %c0_26, %c0_27] : memref<1x1x1xf32, #tpu.memory_space<vmem>>, vector<1x1x1xf32>
    tpu.vector_store %arg5[%c0_25, %c0_26, %c0_27], %57 {strides = array<i32>} : memref<1x1x1xf32, #tpu.memory_space<vmem>>, vector<1x1x1xf32>,
    return
  }
  func.func @transform_0(%arg0: i32) -> (i32, i32, i32) {
    %c0_i32 = arith.constant 0 : i32
    %c0_i32_0 = arith.constant 0 : i32
    %c0_i32_1 = arith.constant 0 : i32
    return %arg0, %c0_i32, %c0_i32_0 : i32, i32, i32
  }
  func.func @transform_1(%arg0: i32) -> (i32, i32, i32) {
    %c0_i32 = arith.constant 0 : i32
    %c0_i32_0 = arith.constant 0 : i32
    %c0_i32_1 = arith.constant 0 : i32
    return %arg0, %c0_i32, %c0_i32_0 : i32, i32, i32
  }
  func.func @transform_2(%arg0: i32) -> (i32, i32) {
    %c0_i32 = arith.constant 0 : i32
    %c0_i32_0 = arith.constant 0 : i32
    %c0_i32_1 = arith.constant 0 : i32
    return %c0_i32, %c0_i32_0 : i32, i32
  }
  func.func @transform_3(%arg0: i32) -> (i32, i32) {
    %c0_i32 = arith.constant 0 : i32
    %c0_i32_0 = arith.constant 0 : i32
    %c0_i32_1 = arith.constant 0 : i32
    return %c0_i32, %c0_i32_0 : i32, i32
  }
  func.func @transform_4(%arg0: i32) -> (i32, i32, i32) {
    %c0_i32 = arith.constant 0 : i32
    %c0_i32_0 = arith.constant 0 : i32
    %c0_i32_1 = arith.constant 0 : i32
    return %arg0, %c0_i32, %c0_i32_0 : i32, i32, i32
  }
}

</mosaic_0001>

<bundles_post_ra>
// kernel: tpu_custom_call.1
= control target key start
LH: loop header
LB: loop body
LE: loop exit
PB: predicated region body
PF: predicated region fallthrough
CT: control target
= control target key end

     0   :  { %9 = vsyncpa [#allocation3], 0  ;;  %s11386_s0 = inlined_call_operand.hbm [shape: f32[8,16,16], index: 0, kind: input, shape index: {}]   ;;  %s11387_s1 = inlined_call_operand.hbm [shape: f32[8,16,16], index: 1, kind: input, shape index: {}]   ;;  %s11388_s2 = inlined_call_operand.hbm [shape: f32[16,16], index: 2, kind: input, shape index: {}]   ;;  %s11389_s3 = inlined_call_operand.hbm [shape: f32[16,16], index: 3, kind: input, shape index: {}]   ;;  %s11390_s4 = inlined_call_operand.vmem [shape: f32[4,1,1], index: 4, kind: output, shape index: {}]  }
   0x1   :  { %11 = vsyncpa [#allocation3 + $0x1], 0 }
   0x2   :  { %12 = vsyncpa [#allocation5], 0 }
   0x3   :  { %14 = vsyncpa [#allocation5 + $0x1], 0 }
   0x4   :  { %15 = vsyncpa [#allocation8], 0  ;;  %s10526_s15 = smov 0   ;;  %s10528_s16 = smov 0  }
   0x5   :  { %s10530_s17 = smov 0   ;;  %s10532_s18 = smov 0  }
   0x6 LB: > { %s10545_s19 = sadd.s32 4294967295, %s10493_s18   ;;  %p41_p0 = scmp.ne.s32.totalorder %s10485_s16, %s10481_s15  ;;  %s10493_s18 = sphi %s10532_s18, %s11407_s18   ;;  %s10489_s17 = sphi %s10530_s17, %s11406_s17   ;;  %s10485_s16 = sphi %s10528_s16, %s11405_s16   ;;  %s10481_s15 = sphi %s10526_s15, %s11404_s15  }
   0x7   : > { %p11391_p1 = scmp.eq.s32.totalorder %s10545_s19, 0  ;;  %p8531_p2 = scmp.ge.s32.totalorder %s10493_s18, 1 }
   0x8   : > { %p146_p3 = scmp.lt.s32.totalorder %s10493_s18, 5  ;;  %s10495_s22 = smov [#allocation6]  }
   0x9   : > { %p10553_p4 = por %p11391_p1, %p41_p0  ;;  %s158_s23 = sshll.u32 %s10495_s22, 4  ;;  %s159_s23 = int_to_ptr.vmem [resolvable:$true] %s158_s23 }
   0xa   : > { %p10557_p5 = pnand %p8531_p2, %p146_p3  ;;  %s10496_s25 = smov [#allocation7]  }
   0xb   : > { %s11394_s20 = scalar_select %p10553_p4, 1, 0 }
   0xc   : > { %s11395_s21 = scalar_select %p10557_p5, 1, 0 }
   0xd   : > { %p10268_p6 = pneg %p10557_p5  ;;  %s171_s26 = sshll.u32 %s10496_s25, 4  ;;  %s10569_s26 = int_to_ptr.vmem [resolvable:$true] %s171_s26 }
   0xe   : > { %s10331_s29 = scalar_lea.hbm %s11388_s2, 256 }
   0xf   : > { %p10565_p7 = pnand %p10268_p6, %p11391_p1  ;;  %p10332_p8 = scmp.ne.s32.totalorder %s11388_s2, %s10331_s29 }
  0x10   : > { %p10338_p12 = scmp.lt.u32.totalorder %s10331_s29, %s11388_s2 }
  0x11   : > { %p10333_p9 = pneg %p10565_p7 }
  0x13   : > { %p10334_p10 = pnand %p10333_p9, %p10332_p8 }
  0x15   : > { %p10335_p11 = pneg %p10334_p10 }
  0x17   : > { %p10340_p13 = pnand %p10338_p12, %p10335_p11 }
  0x19   : > { %10343 = shalt.err (!%p10340_p13)
}
  0x1a   : > { %s10344_s8 = scalar_lea.vmem %s159_s23, 256  ;;  %p10352_p6 = scmp.lt.s32.totalorder %s159_s23, %s159_s23 }
  0x1b   : > { %p10345_p0 = scmp.ne.s32.totalorder %s159_s23, %s10344_s8  ;;  %p10353_p1 = scmp.lt.s32.totalorder %s10344_s8, %s10344_s8 }
  0x1d   : > { %p10347_p2 = pnand %p10345_p0, %p10333_p9  ;;  %p10354_p4 = por %p10353_p1, %p10352_p6 }
  0x1f   : > { %p10348_p3 = pneg %p10347_p2 }
  0x21   : > { %p10355_p5 = pnand %p10354_p4, %p10348_p3 }
  0x23   : > { %10358 = shalt.err (!%p10355_p5)
}
  0x24   : > { %s10497_s9 = smov 128   ;;  %s10498_s10 = smov 8  }
  0x25   : > { %10271 = dma.hbm_to_vmem [thread:$0]  (!%p10565_p7), %s11388_s2, 256, %s159_s23, [#allocation5], %s10497_s9, %s10497_s9, %s10498_s10  }
  0x26   : > { %s10359_s15 = scalar_lea.hbm %s11389_s3, 256 }
  0x27   : > { %p10360_p1 = scmp.ne.s32.totalorder %s11389_s3, %s10359_s15  ;;  %p10366_p8 = scmp.lt.u32.totalorder %s10359_s15, %s11389_s3 }
  0x29   : > { %p10362_p4 = pnand %p10360_p1, %p10333_p9 }
  0x2b   : > { %p10363_p5 = pneg %p10362_p4 }
  0x2d   : > { %p10368_p10 = pnand %p10366_p8, %p10363_p5 }
  0x2f   : > { %10371 = shalt.err (!%p10368_p10)
}
  0x30   : > { %s10372_s23 = scalar_lea.vmem %s10569_s26, 256  ;;  %p10380_p0 = scmp.lt.s32.totalorder %s10569_s26, %s10569_s26 }
  0x31   : > { %p10373_p11 = scmp.ne.s32.totalorder %s10569_s26, %s10372_s23  ;;  %p10381_p2 = scmp.lt.s32.totalorder %s10372_s23, %s10372_s23 }
  0x33   : > { %p10375_p12 = pnand %p10373_p11, %p10333_p9  ;;  %p10382_p3 = por %p10381_p2, %p10380_p0 }
  0x35   : > { %p10376_p13 = pneg %p10375_p12 }
  0x37   : > { %p10383_p6 = pnand %p10382_p3, %p10376_p13 }
  0x39   : > { %10386 = shalt.err (!%p10383_p6)
}
  0x3a   : > { %10274 = dma.hbm_to_vmem [thread:$0]  (!%p10565_p7), %s11389_s3, 256, %s10569_s26, [#allocation8], %s10497_s9, %s10497_s9, %s10498_s10  }
  0x3b   : > { %s10625_s5 = sadd.s32 1, %s10493_s18   ;;  %s28_s24 = sadd.s32 1, %s10489_s17 }
  0x3c   : > { %s25_s6 = ssub.s32 %s10493_s18, %s10625_s5  ;;  %p35_p9 = scmp.ne.s32.totalorder %s10489_s17, %s10485_s16 }
  0x3d   : > { %p26_p1 = scmp.eq.s32.totalorder %s25_s6, 0  ;;  %p36_p4 = scmp.eq.s32.totalorder %s10493_s18, 0 }
  0x3e   : > { %p10284_p5 = scmp.lt.s32.totalorder %s10493_s18, 4  ;;  %s185_s7 = sand.u32 1, %s10489_s17  }
  0x3f   : > { %s10636_s8 = scalar_select %p26_p1, %s10489_s17, %s28_s24  }
  0x40   : > { %p37_p8 = por %p36_p4, %p35_p9  ;;  %s10638_s11 = sshll.u32 %s185_s7, 5 }
  0x41   : > { %s8551_s12 = sshll.u32 %s10493_s18, 9  ;;  %s189_s15 = scalar_lea.vmem [#allocation2], %s10638_s11 }
  0x42   : > { %s10644_s26 = scalar_lea.hbm %s11386_s0, %s8551_s12  ;;  %s197_s22 = sshll.u32 %s189_s15, 4  ;;  %s10651_s22 = int_to_ptr.vmem [resolvable:$true] %s197_s22 }
  0x43   : > { %p10647_p7 = pnand %p10284_p5, %p37_p8  ;;  %s10656_s23 = scalar_lea.hbm %s11387_s1, %s8551_s12 }
  0x44   : > { %s10658_s29 = scalar_lea.sflag [#allocation3], %s185_s7  ;;  %s10387_s30 = scalar_lea.hbm %s10644_s26, 512 }
  0x45   : > { %p10388_p10 = scmp.ne.s32.totalorder %s10644_s26, %s10387_s30  ;;  %p10389_p11 = pneg %p10647_p7 }
  0x46   : > { %s10392_s13 = scalar_lea.hbm %s11386_s0, 2048  ;;  %p10393_p0 = scmp.lt.u32.totalorder %s10644_s26, %s11386_s0 }
  0x47   : > { %p10390_p12 = pnand %p10389_p11, %p10388_p10  ;;  %p10394_p2 = scmp.lt.u32.totalorder %s10392_s13, %s10387_s30 }
  0x48   : > { %p10396_p6 = scmp.lt.u32.totalorder %s10387_s30, %s10644_s26 }
  0x49   : > { %p10391_p13 = pneg %p10390_p12  ;;  %p10395_p3 = por %p10394_p2, %p10393_p0 }
  0x4b   : > { %p10397_p9 = por %p10396_p6, %p10395_p3 }
  0x4d   : > { %p10398_p1 = pnand %p10397_p9, %p10391_p13 }
  0x4f   : > { %10401 = shalt.err (!%p10398_p1)
}
  0x50   : > { %s10402_s7 = scalar_lea.vmem %s10651_s22, 512  ;;  %s10499_s12 = smov [#allocation2]  }
  0x51   : > { %p10403_p4 = scmp.ne.s32.totalorder %s10651_s22, %s10402_s7  ;;  %s10407_s27 = sshll.u32 %s10499_s12, 4  ;;  %s10408_s27 = int_to_ptr.vmem [resolvable:$false] %s10407_s27 }
  0x52   : > { %s10409_s28 = scalar_lea.vmem %s10408_s27, 1024  ;;  %p10410_p10 = scmp.lt.s32.totalorder %s10651_s22, %s10408_s27 }
  0x53   : > { %p10405_p5 = pnand %p10403_p4, %p10389_p11  ;;  %p10411_p12 = scmp.lt.s32.totalorder %s10409_s28, %s10402_s7 }
  0x55   : > { %p10406_p8 = pneg %p10405_p5  ;;  %p10412_p0 = por %p10411_p12, %p10410_p10 }
  0x57   : > { %p10413_p2 = pnand %p10412_p0, %p10406_p8 }
  0x59   : > { %10416 = shalt.err (!%p10413_p2)
}
  0x5a   : > { %10278 = dma.hbm_to_vmem [thread:$0]  (!%p10647_p7), %s10644_s26, 512, %s10651_s22, %s10658_s29, %s10497_s9, %s10497_s9, %s10498_s10  }
  0x5b   : > { %s211_s30 = scalar_lea.vmem [#allocation4], %s10638_s11  ;;  %s207_s6 = sand.u32 1, %s10493_s18  }
  0x5c   : > { %s219_s24 = sshll.u32 %s211_s30, 4  ;;  %s10693_s13 = scalar_lea.sflag [#allocation5], %s207_s6  ;;  %s10691_s24 = int_to_ptr.vmem [resolvable:$true] %s219_s24 }
  0x5d   : > { %s10417_s14 = scalar_lea.hbm %s10656_s23, 512  ;;  %s10422_s12 = scalar_lea.hbm %s11387_s1, 2048 }
  0x5e   : > { %p10418_p13 = scmp.ne.s32.totalorder %s10656_s23, %s10417_s14  ;;  %p10423_p9 = scmp.lt.u32.totalorder %s10656_s23, %s11387_s1 }
  0x5f   : > { %p10424_p1 = scmp.lt.u32.totalorder %s10422_s12, %s10417_s14  ;;  %p10426_p5 = scmp.lt.u32.totalorder %s10417_s14, %s10656_s23 }
  0x60   : > { %p10420_p3 = pnand %p10418_p13, %p10389_p11 }
  0x61   : > { %p10425_p4 = por %p10424_p1, %p10423_p9 }
  0x62   : > { %p10421_p6 = pneg %p10420_p3 }
  0x63   : > { %p10427_p8 = por %p10426_p5, %p10425_p4 }
  0x65   : > { %p10428_p10 = pnand %p10427_p8, %p10421_p6 }
  0x67   : > { %10431 = shalt.err (!%p10428_p10)
}
  0x68   : > { %s10432_s18 = scalar_lea.vmem %s10691_s24, 512  ;;  %s10500_s11 = smov [#allocation4]  }
  0x69   : > { %p10433_p12 = scmp.ne.s32.totalorder %s10691_s24, %s10432_s18  ;;  %s10437_s26 = sshll.u32 %s10500_s11, 4  ;;  %s10438_s26 = int_to_ptr.vmem [resolvable:$false] %s10437_s26 }
  0x6a   : > { %s10439_s22 = scalar_lea.vmem %s10438_s26, 1024  ;;  %p10440_p13 = scmp.lt.s32.totalorder %s10691_s24, %s10438_s26 }
  0x6b   : > { %p10435_p0 = pnand %p10433_p12, %p10389_p11  ;;  %p10441_p3 = scmp.lt.s32.totalorder %s10439_s22, %s10432_s18 }
  0x6d   : > { %p10436_p2 = pneg %p10435_p0  ;;  %p10442_p9 = por %p10441_p3, %p10440_p13 }
  0x6f   : > { %p10443_p1 = pnand %p10442_p9, %p10436_p2 }
  0x71   : > { %10446 = shalt.err (!%p10443_p1)
}
  0x72   : > { %10281 = dma.hbm_to_vmem [thread:$0]  (!%p10647_p7), %s10656_s23, 512, %s10691_s24, %s10693_s13, %s10497_s9, %s10497_s9, %s10498_s10  }
  0x73   : > { %p11398_p11 = scmp.ne.s32.totalorder %s11395_s21, 0 }
  0x74   : > { %s233_s29 = sand.u32 (!%p11398_p11), 1, %s10485_s16   ;;  %p11399_p6 = scmp.ne.s32.totalorder (!%p11398_p11), %s11394_s20, 0 }
  0x75   : > { %231 = sbr.rel (%p11398_p11) target bundleno = 1280 (0x500), region = 36  ;;  %s8544_s30 = sshll.u32 (!%p11398_p11), %s233_s29, 5 }
  0x76   : > { %s234_s6 = scalar_lea.sflag (!%p11398_p11), [#allocation3], %s233_s29  ;;  %s237_s14 = scalar_lea.vmem (!%p11398_p11), [#allocation2], %s8544_s30 }
  0x7c   : > { %10464 = dma.done.wait (%p11399_p6), %s234_s6, 512  }
  0x7d   : > { %10466 = vsyncadd (%p11399_p6), %s234_s6, 4294966784  ;;  %s242_s25 = sand.u32 1, %s10545_s19   ;;  %s10730_s7 = scalar_lea.vmem [#allocation4], %s8544_s30 }
  0x7e   : > { %s243_s15 = scalar_lea.sflag [#allocation5], %s242_s25 }
  0x7f   : > { %10468 = dma.done.wait (%p11399_p6), %s243_s15, 512  }
  0x80   : > { %10470 = vsyncadd (%p11399_p6), %s243_s15, 4294966784  ;;  %p11400_p7 = scmp.eq.s32.totalorder %s10545_s19, 0 }
  0x82   : > { %10472 = dma.done.wait (%p11400_p7), [#allocation5], 256   ;;  %p11401_p4 = pmov %p11400_p7 }
  0x84   : > { %10474 = vsyncadd (%p11401_p4), [#allocation5], 4294967040  ;;  %p11402_p5 = pmov %p11401_p4 }
  0x85   : > { %p11403_p8 = pmov %p11401_p4 }
  0x86   : > { %10476 = dma.done.wait (%p11402_p5), [#allocation8], 256  }
  0x87   : > { %10478 = vsyncadd (%p11403_p8), [#allocation8], 4294967040  ;;  %vm299_vm0 = vcmask 130048   ;;  %v295_v0 = vld [vmem:[#allocation7] sm:$0xff]  ;;  %v296_v1 = vld [vmem:[#allocation7 + $0x8] sm:$0xff]  ;;  %p284_p10 = scmp.lt.s32.totalorder %s10545_s19, 3 }
  0x88   : > { %v10744_v2 = vld [vmem:[%s237_s14] sm:$0xff]  ;;  %v313_v3 = vand.u32 4294901760, %v295_v0  ;;  %v316_v4 = vand.u32 4294901760, %v296_v1  ;;  %v10751_v7 = vld [vmem:[%s237_s14 + $0x8] sm:$0xff]  ;;  %v10764_v12 = vld [vmem:[%s237_s14 + $0x10] sm:$0xff]  ;;  %vm8427_vm1 = vcmask 0  }
  0x89   : > { %v10747_v5 = vld [vmem:[%s10730_s7] sm:$0xff]  ;;  %v301_v6 = vsel %vm299_vm0, %v10744_v2, 0  ;;  %v10760_v10 = vld [vmem:[%s10730_s7 + $0x8] sm:$0xff]  ;;  %v304_v11 = vsel %vm299_vm0, %v10751_v7, 0  ;;  %v10766_v13 = vld [vmem:[%s237_s14 + $0x18] sm:$0xff]  ;;  %v307_v18 = vsel %vm299_vm0, %v10764_v12, 0 }
  0x8a   : > { %v10753_v8 = vand.u32 4294901760, %v301_v6  ;;  %v10757_v9 = vmul.f32 %v10747_v5, %v10744_v2  ;;  %v10768_v14 = vpack.c.bf16 %v316_v4, %v313_v3  ;;  %v10770_v15 = vand.u32 4294901760, %v304_v11  ;;  %v10810_v49 = vld [vmem:[%s10730_s7 + $0x10] sm:$0xff]  ;;  %v10821_v53 = vld [vmem:[%s10730_s7 + $0x18] sm:$0xff]  ;;  %s11409_s19 = smov (!%p284_p10, %s10545_s19), 3 }
  0x8b   : > { %v10774_v16 = vmul.f32 %v10760_v10, %v10751_v7  ;;  %v310_v19 = vsel %vm299_vm0, %v10766_v13, 0  ;;  %v10783_v21 = vand.u32 4294901760, %v307_v18  ;;  %v421_v24 = vsub.f32 %v295_v0, %v313_v3  ;;  %s286_s9 = scalar_lea.vmem %s11390_s4, %s11409_s19 }
  0x8c   : > { %v380_v17 = vsub.f32 %v301_v6, %v10753_v8  ;;  %9695 = vmatprep.subr.bf16.mxu0 %v10768_v14  ;;  %v390_v20 = vsub.f32 %v304_v11, %v10770_v15  ;;  %v10786_v23 = vand.u32 4294901760, %v310_v19  ;;  %v428_v27 = vsub.f32 %v296_v1, %v316_v4 }
  0x8d   : > { %9697 = vmatpush3.bf16.msra.mxu0 %v10768_v14  ;;  %v400_v26 = vsub.f32 %v307_v18, %v10783_v21  ;;  %v422_v30 = vand.u32 4294901760, %v421_v24  ;;  %v1911_v48 = vsel %vm299_vm0, %v10747_v5, 0  ;;  %v1914_v51 = vsel %vm299_vm0, %v10760_v10, 0 }
  0x8e   : > { %v381_v22 = vand.u32 4294901760, %v380_v17  ;;  %v391_v25 = vand.u32 4294901760, %v390_v20  ;;  %v410_v29 = vsub.f32 %v310_v19, %v10786_v23  ;;  %v429_v33 = vand.u32 4294901760, %v428_v27 }
  0x8f   : > { %v401_v32 = vand.u32 4294901760, %v400_v26  ;;  %v423_v36 = vsub.f32 %v421_v24, %v422_v30  ;;  %v10792_v46 = vpack.c.bf16 %v428_v27, %v421_v24  ;;  %v10813_v50 = vand.u32 4294901760, %v1911_v48 }
  0x90   : > { %v382_v28 = vsub.f32 %v380_v17, %v381_v22  ;;  %v392_v31 = vsub.f32 %v390_v20, %v391_v25  ;;  %v411_v35 = vand.u32 4294901760, %v410_v29  ;;  %v430_v39 = vsub.f32 %v428_v27, %v429_v33 }
  0x91   : > { %v402_v38 = vsub.f32 %v400_v26, %v401_v32  ;;  %v424_v41 = vand.u32 4294901760, %v423_v36  ;;  %v10803_v47 = vpack.c.bf16 %v429_v33, %v422_v30  ;;  %v1917_v52 = vsel %vm299_vm0, %v10810_v49, 0 }
  0x92   : > { %v383_v34 = vand.u32 4294901760, %v382_v28  ;;  %v393_v37 = vand.u32 4294901760, %v392_v31  ;;  %v412_v40 = vsub.f32 %v410_v29, %v411_v35  ;;  %v431_v43 = vand.u32 4294901760, %v430_v39 }
  0x93   : > { %v403_v42 = vand.u32 4294901760, %v402_v38  ;;  %v10823_v54 = vand.u32 4294901760, %v1914_v51  ;;  %v1990_v55 = vsub.f32 %v1911_v48, %v10813_v50  ;;  %v10827_v56 = vand.u32 4294901760, %v1917_v52 }
  0x94   : > { %8978 = vmatprep.mubr.f32.mxu0 %v383_v34  ;;  %v413_v44 = vand.u32 4294901760, %v412_v40  ;;  %v10790_v45 = vpack.c.bf16 %v431_v43, %v424_v41  ;;  %v1920_v57 = vsel %vm299_vm0, %v10821_v53, 0  ;;  %v5138_v48 = vmul.f32 %v10747_v5, %v10747_v5 }
  0x95   : > { %8979 = vmatmul.mubr.f32.vlgmr.msra.gmra.mrb[0].mxu0 %v393_v37  ;;  %v2000_v58 = vsub.f32 %v1914_v51, %v10823_v54  ;;  %v10833_v59 = vand.u32 4294901760, %v1920_v57  ;;  %v1991_v60 = vand.u32 4294901760, %v1990_v55  ;;  %v2010_v61 = vsub.f32 %v1917_v52, %v10827_v56 }
  0x96   : > { %8981 = vmatprep.mubr.f32.mxu0 %v403_v42  ;;  %9699 = vmatprep.subr.bf16.mxu0 %v10790_v45  ;;  %v5143_v51 = vsel %vm299_vm0, %v5138_v48, 0  ;;  %v5140_v52 = vmul.f32 %v10810_v49, %v10810_v49  ;;  %v5141_v5 = vmul.f32 %v10821_v53, %v10821_v53 }
  0x97   : > { %9701 = vmatpush3.bf16.msra.mxu0 %v10790_v45  ;;  %v2001_v62 = vand.u32 4294901760, %v2000_v58  ;;  %v2020_v63 = vsub.f32 %v1920_v57, %v10833_v59  ;;  %v1992_v0 = vsub.f32 %v1990_v55, %v1991_v60  ;;  %v2011_v1 = vand.u32 4294901760, %v2010_v61 }
  0x98   : > { %9703 = vmatprep.subr.bf16.mxu0 %v10792_v46  ;;  %v5149_v57 = vsel %vm299_vm0, %v5140_v52, 0 }
  0x99   : > { %8982 = vmatmul.mubr.f32.gmra.mrb[2].mxu0 %v413_v44  ;;  %v2002_v3 = vsub.f32 %v2000_v58, %v2001_v62  ;;  %v2021_v4 = vand.u32 4294901760, %v2020_v63  ;;  %v1993_v6 = vand.u32 4294901760, %v1992_v0  ;;  %v2012_v11 = vsub.f32 %v2010_v61, %v2011_v1 }
  0x9a   : > { %8988 = vmatprep.mubr.f32.mxu0 %v10753_v8 }
  0x9b   : > { %v2022_v18 = vsub.f32 %v2020_v63, %v2021_v4 }
  0x9d   : > { %8989 = vmatmul.mubr.f32.vlgmr.msra.gmra.mrb[0].mxu0 %v10770_v15  ;;  %v2023_v19 = vand.u32 4294901760, %v2022_v18 }
  0x9e   : > { %8991 = vmatprep.mubr.f32.mxu0 %v10783_v21  ;;  %9705 = vmatpush3.bf16.msra.mxu0 %v10792_v46 }
  0x9f   : > { %9707 = vmatprep.subr.bf16.mxu0 %v10768_v14 }
  0xa1   : > { %8992 = vmatmul.mubr.f32.gmra.mrb[2].mxu0 %v10786_v23 }
  0xa2   : > { %8998 = vmatprep.mubr.f32.mxu0 %v380_v17  ;;  %v2003_v17 = vand.u32 4294901760, %v2002_v3 }
  0xa5   : > { %8999 = vmatmul.mubr.f32.vlgmr.msra.gmra.mrb[0].mxu0 %v390_v20  ;;  %v3527_v20 = vmul.f32 %v10751_v7, %v10751_v7 }
  0xa6   : > { %9001 = vmatprep.mubr.f32.mxu0 %v400_v26  ;;  %9709 = vmatpush3.bf16.msra.mxu0 %v10768_v14 }
  0xa7   : > { %9711 = vmatprep.subr.bf16.mxu0 %v10803_v47 }
  0xa9   : > { %9002 = vmatmul.mubr.f32.gmra.mrb[2].mxu0 %v410_v29 }
  0xaa   : > { %9008 = vmatprep.mubr.f32.mxu0 %v381_v22  ;;  %v3528_v22 = vmul.f32 %v10764_v12, %v10764_v12 }
  0xac   : > { %v3537_v7 = vsel %vm299_vm0, %v3528_v22, 0 }
  0xad   : > { %9009 = vmatmul.mubr.f32.vlgmr.msra.gmra.mrb[0].mxu0 %v391_v25  ;;  %v10876_v27 = vand.u32 4294901760, %v3537_v7 }
  0xae   : > { %9011 = vmatprep.mubr.f32.mxu0 %v401_v32  ;;  %9713 = vmatpush3.bf16.msra.mxu0 %v10803_v47 }
  0xaf   : > { %9715 = vmatprep.subr.bf16.mxu0 %v10768_v14  ;;  %v3630_v32 = vsub.f32 %v3537_v7, %v10876_v27 }
  0xb1   : > { %9012 = vmatmul.mubr.f32.gmra.mrb[2].mxu0 %v411_v35  ;;  %v3631_v36 = vand.u32 4294901760, %v3630_v32 }
  0xb2   : > { %9018 = vmatprep.mubr.f32.mxu0 %v10753_v8 }
  0xb3   : > { %v3632_v40 = vsub.f32 %v3630_v32, %v3631_v36 }
  0xb5   : > { %9019 = vmatmul.mubr.f32.vlgmr.msra.gmra.mrb[0].mxu0 %v10770_v15  ;;  %v3633_v43 = vand.u32 4294901760, %v3632_v40 }
  0xb6   : > { %9021 = vmatprep.mubr.f32.mxu0 %v10783_v21  ;;  %9717 = vmatpush3.bf16.msra.mxu0 %v10768_v14 }
  0xb7   : > { %9767 = vmatprep.subr.bf16.mxu0 %v10768_v14 }
  0xb9   : > { %9022 = vmatmul.mubr.f32.gmra.mrb[2].mxu0 %v10786_v23 }
  0xba   : > { %9028 = vmatprep.mubr.f32.mxu0 %v10753_v8  ;;  %v2013_v8 = vand.u32 4294901760, %v2012_v11 }
  0xbd   : > { %9029 = vmatmul.mubr.f32.vlgmr.msra.gmra.mrb[0].mxu0 %v10770_v15  ;;  %v3526_v15 = vmul.f32 %v10744_v2, %v10744_v2  ;;  %v3529_v2 = vmul.f32 %v10766_v13, %v10766_v13 }
  0xbe   : > { %9031 = vmatprep.mubr.f32.mxu0 %v10783_v21  ;;  %9769 = vmatpush3.bf16.msra.mxu0 %v10768_v14 }
  0xbf   : > { %9771 = vmatprep.subr.bf16.mxu0 %v10790_v45  ;;  %v3531_v21 = vsel %vm299_vm0, %v3526_v15, 0  ;;  %v3540_v28 = vsel %vm299_vm0, %v3529_v2, 0 }
  0xc0   : > { %v10866_v24 = vand.u32 4294901760, %v3531_v21  ;;  %v10881_v30 = vand.u32 4294901760, %v3540_v28 }
  0xc1   : > { %9032 = vmatmul.mubr.f32.gmra.mrb[2].mxu0 %v10786_v23  ;;  %v3534_v23 = vsel %vm299_vm0, %v3527_v20, 0 }
  0xc2   : > { %9122 = vmatprep.mubr.f32.mxu0 %v1993_v6  ;;  %v10872_v25 = vand.u32 4294901760, %v3534_v23  ;;  %v3610_v26 = vsub.f32 %v3531_v21, %v10866_v24  ;;  %v3640_v34 = vsub.f32 %v3540_v28, %v10881_v30 }
  0xc4   : > { %v3620_v29 = vsub.f32 %v3534_v23, %v10872_v25  ;;  %v3611_v31 = vand.u32 4294901760, %v3610_v26  ;;  %v3641_v38 = vand.u32 4294901760, %v3640_v34 }
  0xc5   : > { %9123 = vmatmul.mubr.f32.vlgmr.msra.gmra.mrb[4].mxu0 %v2003_v17 }
  0xc6   : > { %9125 = vmatprep.mubr.f32.mxu0 %v2013_v8  ;;  %9773 = vmatpush3.bf16.msra.mxu0 %v10790_v45  ;;  %v3621_v33 = vand.u32 4294901760, %v3620_v29  ;;  %v3612_v35 = vsub.f32 %v3610_v26, %v3611_v31  ;;  %v3642_v42 = vsub.f32 %v3640_v34, %v3641_v38 }
  0xc7   : > { %9775 = vmatprep.subr.bf16.mxu0 %v10792_v46 }
  0xc8   : > { %v3622_v37 = vsub.f32 %v3620_v29, %v3621_v33  ;;  %v3613_v39 = vand.u32 4294901760, %v3612_v35  ;;  %v3643_v44 = vand.u32 4294901760, %v3642_v42 }
  0xc9   : > { %9126 = vmatmul.mubr.f32.gmra.mrb[6].mxu0 %v2023_v19 }
  0xca   : > { %9132 = vmatprep.mubr.f32.mxu0 %v10813_v50  ;;  %v3623_v41 = vand.u32 4294901760, %v3622_v37 }
  0xcd   : > { %9133 = vmatmul.mubr.f32.vlgmr.msra.gmra.mrb[4].mxu0 %v10823_v54 }
  0xce   : > { %9135 = vmatprep.mubr.f32.mxu0 %v10827_v56  ;;  %9777 = vmatpush3.bf16.msra.mxu0 %v10792_v46 }
  0xcf   : > { %9779 = vmatprep.subr.bf16.mxu0 %v10768_v14 }
  0xd1   : > { %9136 = vmatmul.mubr.f32.gmra.mrb[6].mxu0 %v10833_v59 }
  0xd2   : > { %9142 = vmatprep.mubr.f32.mxu0 %v1990_v55  ;;  %v10913_v55 = vand.u32 4294901760, %v5143_v51 }
  0xd5   : > { %9143 = vmatmul.mubr.f32.vlgmr.msra.gmra.mrb[4].mxu0 %v2000_v58 }
  0xd6   : > { %9145 = vmatprep.mubr.f32.mxu0 %v2010_v61  ;;  %9781 = vmatpush3.bf16.msra.mxu0 %v10768_v14  ;;  %v5222_v61 = vsub.f32 %v5143_v51, %v10913_v55 }
  0xd7   : > { %9783 = vmatprep.subr.bf16.mxu0 %v10803_v47 }
  0xd8   : > { %v5223_v6 = vand.u32 4294901760, %v5222_v61 }
  0xd9   : > { %9146 = vmatmul.mubr.f32.gmra.mrb[6].mxu0 %v2020_v63  ;;  %v5152_v63 = vsel %vm299_vm0, %v5141_v5, 0 }
  0xda   : > { %9152 = vmatprep.mubr.f32.mxu0 %v1991_v60  ;;  %v10938_v3 = vand.u32 4294901760, %v5152_v63  ;;  %v5224_v19 = vsub.f32 %v5222_v61, %v5223_v6 }
  0xdc   : > { %v5252_v8 = vsub.f32 %v5152_v63, %v10938_v3  ;;  %v5225_v22 = vand.u32 4294901760, %v5224_v19 }
  0xdd   : > { %9153 = vmatmul.mubr.f32.vlgmr.msra.gmra.mrb[4].mxu0 %v2001_v62  ;;  %v10930_v62 = vand.u32 4294901760, %v5149_v57 }
  0xde   : > { %9155 = vmatprep.mubr.f32.mxu0 %v2011_v1  ;;  %9785 = vmatpush3.bf16.msra.mxu0 %v10803_v47  ;;  %v5253_v21 = vand.u32 4294901760, %v5252_v8 }
  0xdf   : > { %9787 = vmatprep.subr.bf16.mxu0 %v10768_v14  ;;  %v5242_v11 = vsub.f32 %v5149_v57, %v10930_v62 }
  0xe0   : > { %v5254_v7 = vsub.f32 %v5252_v8, %v5253_v21 }
  0xe1   : > { %9156 = vmatmul.mubr.f32.gmra.mrb[6].mxu0 %v2021_v4  ;;  %v5243_v15 = vand.u32 4294901760, %v5242_v11 }
  0xe2   : > { %9162 = vmatprep.mubr.f32.mxu0 %v10813_v50 }
  0xe3   : > { %v5244_v23 = vsub.f32 %v5242_v11, %v5243_v15 }
  0xe5   : > { %9163 = vmatmul.mubr.f32.vlgmr.msra.gmra.mrb[4].mxu0 %v10823_v54 }
  0xe6   : > { %9165 = vmatprep.mubr.f32.mxu0 %v10827_v56  ;;  %9789 = vmatpush3.bf16.msra.mxu0 %v10768_v14 }
  0xe7   : > { %9839 = vmatprep.subr.bf16.mxu0 %v10768_v14 }
  0xe9   : > { %9166 = vmatmul.mubr.f32.gmra.mrb[6].mxu0 %v10833_v59 }
  0xea   : > { %9172 = vmatprep.mubr.f32.mxu0 %v10813_v50  ;;  %v5139_v50 = vmul.f32 %v10760_v10, %v10760_v10 }
  0xed   : > { %9173 = vmatmul.mubr.f32.vlgmr.msra.gmra.mrb[4].mxu0 %v10823_v54  ;;  %v297_v54 = vld [vmem:[#allocation6] sm:$0xff] }
  0xee   : > { %9175 = vmatprep.mubr.f32.mxu0 %v10827_v56  ;;  %9841 = vmatpush3.bf16.msra.mxu0 %v10768_v14  ;;  %v5146_v56 = vsel %vm299_vm0, %v5139_v50, 0  ;;  %v901_v10 = vsel %vm299_vm0, %v297_v54, 0 }
  0xef   : > { %9843 = vmatprep.subr.bf16.mxu0 %v10790_v45  ;;  %v10921_v58 = vand.u32 4294901760, %v901_v10 }
  0xf1   : > { %9176 = vmatmul.mubr.f32.gmra.mrb[6].mxu0 %v10833_v59  ;;  %v10923_v59 = vand.u32 4294901760, %v5146_v56  ;;  %v10926_v60 = vsub.f32 %v901_v10, %v10921_v58 }
  0xf2   : > { %9266 = vmatprep.mubr.f32.mxu0 %v3613_v39 }
  0xf3   : > { %v10934_v0 = vand.u32 4294901760, %v10926_v60  ;;  %v5232_v1 = vsub.f32 %v5146_v56, %v10923_v59 }
  0xf5   : > { %9267 = vmatmul.mubr.f32.vlgmr.msra.gmra.mrb[8].mxu0 %v3623_v41  ;;  %v976_v4 = vsub.f32 %v10926_v60, %v10934_v0  ;;  %v5233_v18 = vand.u32 4294901760, %v5232_v1 }
  0xf6   : > { %9269 = vmatprep.mubr.f32.mxu0 %v3633_v43  ;;  %9845 = vmatpush3.bf16.msra.mxu0 %v10790_v45 }
  0xf7   : > { %9847 = vmatprep.subr.bf16.mxu0 %v10792_v46  ;;  %v10946_v17 = vand.u32 4294901760, %v976_v4  ;;  %v5234_v20 = vsub.f32 %v5232_v1, %v5233_v18 }
  0xf9   : > { %9270 = vmatmul.mubr.f32.gmra.mrb[10].mxu0 %v3643_v44  ;;  %9038 = vmatprep.mubr.f32.mxu1 %v10946_v17  ;;  %v5235_v2 = vand.u32 4294901760, %v5234_v20 }
  0xfa   : > { %9276 = vmatprep.mubr.f32.mxu0 %v10866_v24 }
  0xfd   : > { %9277 = vmatmul.mubr.f32.vlgmr.msra.gmra.mrb[8].mxu0 %v10872_v25 }
  0xfe   : > { %9279 = vmatprep.mubr.f32.mxu0 %v10876_v27  ;;  %9849 = vmatpush3.bf16.msra.mxu0 %v10792_v46 }
  0xff   : > { %9851 = vmatprep.subr.bf16.mxu0 %v10768_v14 }
 0x101   : > { %9280 = vmatmul.mubr.f32.gmra.mrb[10].mxu0 %v10881_v30 }
 0x102   : > { %9286 = vmatprep.mubr.f32.mxu0 %v3610_v26  ;;  %v5255_v26 = vand.u32 4294901760, %v5254_v7 }
 0x105   : > { %9287 = vmatmul.mubr.f32.vlgmr.msra.gmra.mrb[8].mxu0 %v3620_v29  ;;  %v6752_v29 = vmul.f32 %v10810_v49, %v10764_v12 }
 0x106   : > { %9289 = vmatprep.mubr.f32.mxu0 %v3630_v32  ;;  %9853 = vmatpush3.bf16.msra.mxu0 %v10768_v14 }
 0x107   : > { %9855 = vmatprep.subr.bf16.mxu0 %v10803_v47 }
 0x109   : > { %9290 = vmatmul.mubr.f32.gmra.mrb[10].mxu0 %v3640_v34 }
 0x10a   : > { %9296 = vmatprep.mubr.f32.mxu0 %v3611_v31 }
 0x10d   : > { %9297 = vmatmul.mubr.f32.vlgmr.msra.gmra.mrb[8].mxu0 %v3621_v33 }
 0x10e   : > { %9299 = vmatprep.mubr.f32.mxu0 %v3631_v36  ;;  %9857 = vmatpush3.bf16.msra.mxu0 %v10803_v47 }
 0x10f   : > { %9859 = vmatprep.subr.bf16.mxu0 %v10768_v14 }
 0x111   : > { %9300 = vmatmul.mubr.f32.gmra.mrb[10].mxu0 %v3641_v38 }
 0x112   : > { %9306 = vmatprep.mubr.f32.mxu0 %v10866_v24 }
 0x115   : > { %9307 = vmatmul.mubr.f32.vlgmr.msra.gmra.mrb[8].mxu0 %v10872_v25 }
 0x116   : > { %9309 = vmatprep.mubr.f32.mxu0 %v10876_v27  ;;  %9861 = vmatpush3.bf16.msra.mxu0 %v10768_v14 }
 0x117   : > { %9911 = vmatprep.subr.bf16.mxu0 %v10768_v14 }
 0x119   : > { %9310 = vmatmul.mubr.f32.gmra.mrb[10].mxu0 %v10881_v30 }
 0x11a   : > { %9316 = vmatprep.mubr.f32.mxu0 %v10866_v24  ;;  %v5245_v24 = vand.u32 4294901760, %v5244_v23 }
 0x11d   : > { %9317 = vmatmul.mubr.f32.vlgmr.msra.gmra.mrb[8].mxu0 %v10872_v25  ;;  %v6755_v25 = vsel %vm299_vm0, %v10757_v9, 0  ;;  %v6761_v9 = vsel %vm299_vm0, %v6752_v29, 0 }
 0x11e   : > { %9319 = vmatprep.mubr.f32.mxu0 %v10876_v27  ;;  %9913 = vmatpush3.bf16.msra.mxu0 %v10768_v14  ;;  %v6758_v27 = vsel %vm299_vm0, %v10774_v16, 0  ;;  %v10972_v28 = vand.u32 4294901760, %v6755_v25  ;;  %v6853_v32 = vand.u32 4294901760, %v6761_v9 }
 0x11f   : > { %9915 = vmatprep.subr.bf16.mxu0 %v10790_v45  ;;  %v10979_v31 = vand.u32 4294901760, %v6758_v27 }
 0x120   : > { %v6834_v16 = vsub.f32 %v6755_v25, %v10972_v28  ;;  %v6854_v49 = vsub.f32 %v6761_v9, %v6853_v32 }
 0x121   : > { %9320 = vmatmul.mubr.f32.gmra.mrb[10].mxu0 %v10881_v30  ;;  %v6753_v30 = vmul.f32 %v10821_v53, %v10766_v13  ;;  %v6844_v34 = vsub.f32 %v6758_v27, %v10979_v31 }
 0x122   : > { %9410 = vmatprep.mubr.f32.mxu0 %v5225_v22  ;;  %v6835_v13 = vand.u32 4294901760, %v6834_v16  ;;  %v6855_v37 = vand.u32 4294901760, %v6854_v49 }
 0x123   : > { %v6764_v33 = vsel %vm299_vm0, %v6753_v30, 0  ;;  %v6845_v53 = vand.u32 4294901760, %v6844_v34 }
 0x124   : > { %v6863_v12 = vand.u32 4294901760, %v6764_v33  ;;  %v6836_v36 = vsub.f32 %v6834_v16, %v6835_v13  ;;  %v6856_v41 = vsub.f32 %v6854_v49, %v6855_v37 }
 0x125   : > { %9411 = vmatmul.mubr.f32.vlgmr.msra.gmra.mrb[12].mxu0 %v5235_v2  ;;  %v6846_v38 = vsub.f32 %v6844_v34, %v6845_v53 }
 0x126   : > { %9413 = vmatprep.mubr.f32.mxu0 %v5245_v24  ;;  %9917 = vmatpush3.bf16.msra.mxu0 %v10790_v45  ;;  %v6864_v35 = vsub.f32 %v6764_v33, %v6863_v12  ;;  %v6837_v40 = vand.u32 4294901760, %v6836_v36  ;;  %v6857_v44 = vand.u32 4294901760, %v6856_v41 }
 0x127   : > { %9919 = vmatprep.subr.bf16.mxu0 %v10792_v46  ;;  %v6847_v42 = vand.u32 4294901760, %v6846_v38 }
 0x128   : > { %v6865_v39 = vand.u32 4294901760, %v6864_v35 }
 0x129   : > { %9414 = vmatmul.mubr.f32.gmra.mrb[14].mxu0 %v5255_v26 }
 0x12a   : > { %9420 = vmatprep.mubr.f32.mxu0 %v10913_v55  ;;  %v6866_v43 = vsub.f32 %v6864_v35, %v6865_v39 }
 0x12c   : > { %v6867_v48 = vand.u32 4294901760, %v6866_v43 }
 0x12d   : > { %9421 = vmatmul.mubr.f32.vlgmr.msra.gmra.mrb[12].mxu0 %v10923_v59 }
 0x12e   : > { %9423 = vmatprep.mubr.f32.mxu0 %v10930_v62  ;;  %9921 = vmatpush3.bf16.msra.mxu0 %v10792_v46 }
 0x12f   : > { %9923 = vmatprep.subr.bf16.mxu0 %v10768_v14 }
 0x131   : > { %9424 = vmatmul.mubr.f32.gmra.mrb[14].mxu0 %v10938_v3 }
 0x132   : > { %9430 = vmatprep.mubr.f32.mxu0 %v5222_v61 }
 0x135   : > { %9431 = vmatmul.mubr.f32.vlgmr.msra.gmra.mrb[12].mxu0 %v5232_v1 }
 0x136   : > { %9433 = vmatprep.mubr.f32.mxu0 %v5242_v11  ;;  %9925 = vmatpush3.bf16.msra.mxu0 %v10768_v14 }
 0x137   : > { %9927 = vmatprep.subr.bf16.mxu0 %v10803_v47 }
 0x139   : > { %9434 = vmatmul.mubr.f32.gmra.mrb[14].mxu0 %v5252_v8 }
 0x13a   : > { %9440 = vmatprep.mubr.f32.mxu0 %v5223_v6 }
 0x13d   : > { %9441 = vmatmul.mubr.f32.vlgmr.msra.gmra.mrb[12].mxu0 %v5233_v18 }
 0x13e   : > { %9443 = vmatprep.mubr.f32.mxu0 %v5243_v15  ;;  %9929 = vmatpush3.bf16.msra.mxu0 %v10803_v47 }
 0x13f   : > { %9931 = vmatprep.subr.bf16.mxu0 %v10768_v14 }
 0x141   : > { %9444 = vmatmul.mubr.f32.gmra.mrb[14].mxu0 %v5253_v21 }
 0x142   : > { %9450 = vmatprep.mubr.f32.mxu0 %v10913_v55 }
 0x145   : > { %9451 = vmatmul.mubr.f32.vlgmr.msra.gmra.mrb[12].mxu0 %v10923_v59 }
 0x146   : > { %9453 = vmatprep.mubr.f32.mxu0 %v10930_v62  ;;  %9933 = vmatpush3.bf16.msra.mxu0 %v10768_v14 }
 0x147   : > { %9983 = vmatprep.subr.bf16.mxu0 %v10768_v14 }
 0x149   : > { %9454 = vmatmul.mubr.f32.gmra.mrb[14].mxu0 %v10938_v3 }
 0x14a   : > { %9460 = vmatprep.mubr.f32.mxu0 %v10913_v55 }
 0x14d   : > { %9461 = vmatmul.mubr.f32.vlgmr.msra.gmra.mrb[12].mxu0 %v10923_v59 }
 0x14e   : > { %9463 = vmatprep.mubr.f32.mxu0 %v10930_v62  ;;  %9985 = vmatpush3.bf16.msra.mxu0 %v10768_v14 }
 0x14f   : > { %9987 = vmatprep.subr.bf16.mxu0 %v10790_v45 }
 0x151   : > { %9464 = vmatmul.mubr.f32.gmra.mrb[14].mxu0 %v10938_v3 }
 0x152   : > { %9554 = vmatprep.mubr.f32.mxu0 %v6837_v40 }
 0x155   : > { %9555 = vmatmul.mubr.f32.vlgmr.msra.gmra.mrb[16].mxu0 %v6847_v42 }
 0x156   : > { %9557 = vmatprep.mubr.f32.mxu0 %v6857_v44  ;;  %9989 = vmatpush3.bf16.msra.mxu0 %v10790_v45  ;;  %v298_v45 = vld [vmem:[#allocation6 + $0x8] sm:$0xff] }
 0x157   : > { %9991 = vmatprep.subr.bf16.mxu0 %v10792_v46 }
 0x159   : > { %9558 = vmatmul.mubr.f32.gmra.mrb[18].mxu0 %v6867_v48 }
 0x15a   : > { %9564 = vmatprep.mubr.f32.mxu0 %v10972_v28 }
 0x15d   : > { %9565 = vmatmul.mubr.f32.vlgmr.msra.gmra.mrb[16].mxu0 %v10979_v31 }
 0x15e   : > { %9567 = vmatprep.mubr.f32.mxu0 %v6853_v32  ;;  %9993 = vmatpush3.bf16.msra.mxu0 %v10792_v46  ;;  %v904_v46 = vsel %vm299_vm0, %v298_v45, 0 }
 0x15f   : > { %9995 = vmatprep.subr.bf16.mxu0 %v10768_v14 }
 0x161   : > { %9568 = vmatmul.mubr.f32.gmra.mrb[18].mxu0 %v6863_v12 }
 0x162   : > { %9574 = vmatprep.mubr.f32.mxu0 %v6834_v16 }
 0x165   : > { %9575 = vmatmul.mubr.f32.vlgmr.msra.gmra.mrb[16].mxu0 %v6844_v34 }
 0x166   : > { %9577 = vmatprep.mubr.f32.mxu0 %v6854_v49  ;;  %9997 = vmatpush3.bf16.msra.mxu0 %v10768_v14 }
 0x167   : > { %9999 = vmatprep.subr.bf16.mxu0 %v10803_v47 }
 0x169   : > { %9578 = vmatmul.mubr.f32.gmra.mrb[18].mxu0 %v6864_v35 }
 0x16a   : > { %9584 = vmatprep.mubr.f32.mxu0 %v6835_v13 }
 0x16d   : > { %9585 = vmatmul.mubr.f32.vlgmr.msra.gmra.mrb[16].mxu0 %v6845_v53 }
 0x16e   : > { %9587 = vmatprep.mubr.f32.mxu0 %v6855_v37  ;;  %10001 = vmatpush3.bf16.msra.mxu0 %v10803_v47  ;;  %v11013_v47 = vand.u32 4294901760, %v904_v46 }
 0x16f   : > { %10003 = vmatprep.subr.bf16.mxu0 %v10768_v14 }
 0x170   : > { %v11016_v50 = vsub.f32 %v904_v46, %v11013_v47 }
 0x171   : > { %9588 = vmatmul.mubr.f32.gmra.mrb[18].mxu0 %v6865_v39 }
 0x172   : > { %9594 = vmatprep.mubr.f32.mxu0 %v10972_v28  ;;  %v11019_v51 = vand.u32 4294901760, %v11016_v50 }
 0x174   : > { %v986_v56 = vsub.f32 %v11016_v50, %v11019_v51 }
 0x175   : > { %9595 = vmatmul.mubr.f32.vlgmr.msra.gmra.mrb[16].mxu0 %v10979_v31 }
 0x176   : > { %9597 = vmatprep.mubr.f32.mxu0 %v6853_v32  ;;  %10005 = vmatpush3.bf16.msra.mxu0 %v10768_v14  ;;  %v11023_v4 = vand.u32 4294901760, %v986_v56 }
 0x179   : > { %9598 = vmatmul.mubr.f32.gmra.mrb[18].mxu0 %v6863_v12 }
 0x17a   : > { %9604 = vmatprep.mubr.f32.mxu0 %v10972_v28 }
 0x17d   : > { %9605 = vmatmul.mubr.f32.vlgmr.msra.gmra.mrb[16].mxu0 %v10979_v31 }
 0x17e   : > { %9607 = vmatprep.mubr.f32.mxu0 %v6853_v32 }
 0x181   : > { %9608 = vmatmul.mubr.f32.gmra.mrb[18].mxu0 %v6863_v12 }
 0x190   : > { %v9030_v52 = vpop.f32.mrb[0].mxu0 }
 0x191   : > { %v910_v14 = vand.u32 4294901760, %v9030_v52  ;;  %v878_v54 = vpop.f32.mrb[1].mxu0 }
 0x192   : > { %v907_v55 = vand.u32 4294901760, %v878_v54 }
 0x193   : > { %v1002_v5 = vsub.f32 %v9030_v52, %v910_v14 }
 0x194   : > { %v9718_v10 = vpack.c.bf16 %v910_v14, %v907_v55  ;;  %v995_v57 = vsub.f32 %v878_v54, %v907_v55  ;;  %v9033_v59 = vpop.f32.mrb[2].mxu0 }
 0x195   : > { %v1003_v61 = vand.u32 4294901760, %v1002_v5  ;;  %v1412_v62 = vand.u32 4294901760, %v9033_v59  ;;  %v890_v63 = vpop.f32.mrb[3].mxu0 }
 0x196   : > { %v996_v1 = vand.u32 4294901760, %v995_v57  ;;  %v1409_v3 = vand.u32 4294901760, %v890_v63  ;;  %9719 = vmatprep.subr.bf16.mxu1 %v9718_v10  ;;  %v9726_v6 = vpack.c.bf16 %v1002_v5, %v995_v57 }
 0x197   : > { %v1004_v11 = vsub.f32 %v1002_v5, %v1003_v61  ;;  %v1504_v18 = vsub.f32 %v9033_v59, %v1412_v62  ;;  %9721 = vmatpush3.bf16.msra.mxu1 %v9718_v10 }
 0x198   : > { %v997_v8 = vsub.f32 %v995_v57, %v996_v1  ;;  %v11025_v19 = vpack.c.bf16 %v1412_v62, %v1409_v3  ;;  %v1497_v15 = vsub.f32 %v890_v63, %v1409_v3  ;;  %v9734_v20 = vpack.c.bf16 %v1003_v61, %v996_v1 }
 0x199   : > { %v1505_v21 = vand.u32 4294901760, %v1504_v18  ;;  %v1005_v22 = vand.u32 4294901760, %v1004_v11 }
 0x19a   : > { %v1498_v23 = vand.u32 4294901760, %v1497_v15  ;;  %9039 = vmatmul.mubr.f32.vlgmr.msra.gmra.mrb[0].mxu1 %v11023_v4  ;;  %v998_v2 = vand.u32 4294901760, %v997_v8  ;;  %v11028_v7 = vpack.c.bf16 %v1504_v18, %v1497_v15 }
 0x19b   : > { %v1506_v24 = vsub.f32 %v1504_v18, %v1505_v21  ;;  %9045 = vmatprep.mubr.f32.mxu1 %v10921_v58 }
 0x19c   : > { %v1499_v26 = vsub.f32 %v1497_v15, %v1498_v23  ;;  %v9722_v25 = vpack.c.bf16 %v1005_v22, %v998_v2  ;;  %v11031_v27 = vpack.c.bf16 %v1505_v21, %v1498_v23 }
 0x19d   : > { %v1507_v28 = vand.u32 4294901760, %v1506_v24 }
 0x19e   : > { %9723 = vmatprep.subr.bf16.mxu1 %v9722_v25  ;;  %v1500_v29 = vand.u32 4294901760, %v1499_v26 }
 0x19f   : > { %9725 = vmatpush3.bf16.msra.mxu1 %v9722_v25 }
 0x1a0   : > { %9727 = vmatprep.subr.bf16.mxu1 %v9726_v6  ;;  %v9746_v30 = vpack.c.bf16 %v1507_v28, %v1500_v29 }
 0x1a2   : > { %9046 = vmatmul.mubr.f32.vlgmr.msra.gmra.mrb[0].mxu1 %v11013_v47 }
 0x1a3   : > { %9729 = vmatpush3.bf16.msra.mxu1 %v9726_v6  ;;  %9052 = vmatprep.mubr.f32.mxu1 %v10926_v60 }
 0x1a4   : > { %9731 = vmatprep.subr.bf16.mxu1 %v9718_v10 }
 0x1aa   : > { %9053 = vmatmul.mubr.f32.vlgmr.msra.gmra.mrb[0].mxu1 %v11016_v50 }
 0x1ab   : > { %9733 = vmatpush3.bf16.msra.mxu1 %v9718_v10  ;;  %9059 = vmatprep.mubr.f32.mxu1 %v10934_v0 }
 0x1ac   : > { %9735 = vmatprep.subr.bf16.mxu1 %v9734_v20 }
 0x1b2   : > { %9060 = vmatmul.mubr.f32.vlgmr.msra.gmra.mrb[0].mxu1 %v11019_v51 }
 0x1b3   : > { %9737 = vmatpush3.bf16.msra.mxu1 %v9734_v20  ;;  %9066 = vmatprep.mubr.f32.mxu1 %v10921_v58 }
 0x1b4   : > { %9739 = vmatprep.subr.bf16.mxu1 %v9718_v10 }
 0x1ba   : > { %9067 = vmatmul.mubr.f32.vlgmr.msra.gmra.mrb[0].mxu1 %v11013_v47 }
 0x1bb   : > { %9741 = vmatpush3.bf16.msra.mxu1 %v9718_v10  ;;  %9073 = vmatprep.mubr.f32.mxu1 %v10921_v58 }
 0x1bc   : > { %9743 = vmatprep.subr.bf16.mxu1 %v11025_v19 }
 0x1c0   : > { %v9174_v31 = vpop.f32.mrb[4].mxu0 }
 0x1c1   : > { %v2514_v9 = vand.u32 4294901760, %v9174_v31  ;;  %v2488_v16 = vpop.f32.mrb[5].mxu0 }
 0x1c2   : > { %v2511_v32 = vand.u32 4294901760, %v2488_v16  ;;  %9074 = vmatmul.mubr.f32.vlgmr.msra.gmra.mrb[0].mxu1 %v11013_v47 }
 0x1c3   : > { %v2606_v33 = vsub.f32 %v9174_v31, %v2514_v9  ;;  %9745 = vmatpush3.bf16.msra.mxu1 %v11025_v19  ;;  %9080 = vmatprep.mubr.f32.mxu1 %v10946_v17 }
 0x1c4   : > { %v11045_v34 = vpack.c.bf16 %v2514_v9, %v2511_v32  ;;  %v2599_v12 = vsub.f32 %v2488_v16, %v2511_v32  ;;  %9747 = vmatprep.subr.bf16.mxu1 %v9746_v30  ;;  %v9177_v13 = vpop.f32.mrb[6].mxu0 }
 0x1c5   : > { %v2607_v49 = vand.u32 4294901760, %v2606_v33  ;;  %v3016_v53 = vand.u32 4294901760, %v9177_v13  ;;  %v2500_v35 = vpop.f32.mrb[7].mxu0 }
 0x1c6   : > { %v2600_v36 = vand.u32 4294901760, %v2599_v12  ;;  %v3013_v37 = vand.u32 4294901760, %v2500_v35  ;;  %9081 = vmatmul.mubr.f32.vlgmr.msra.gmra.mrb[2].mxu1 %v11023_v4  ;;  %v11048_v38 = vpack.c.bf16 %v2606_v33, %v2599_v12 }
 0x1c7   : > { %v2608_v39 = vsub.f32 %v2606_v33, %v2607_v49  ;;  %v3108_v40 = vsub.f32 %v9177_v13, %v3016_v53  ;;  %9749 = vmatpush3.bf16.msra.mxu1 %v9746_v30  ;;  %9087 = vmatprep.mubr.f32.mxu1 %v10921_v58 }
 0x1c8   : > { %v2601_v41 = vsub.f32 %v2599_v12, %v2600_v36  ;;  %v11051_v42 = vpack.c.bf16 %v3016_v53, %v3013_v37  ;;  %v3101_v43 = vsub.f32 %v2500_v35, %v3013_v37  ;;  %9751 = vmatprep.subr.bf16.mxu1 %v11028_v7  ;;  %v11054_v44 = vpack.c.bf16 %v2607_v49, %v2600_v36 }
 0x1c9   : > { %v3109_v48 = vand.u32 4294901760, %v3108_v40  ;;  %v2609_v45 = vand.u32 4294901760, %v2608_v39 }
 0x1ca   : > { %v3102_v46 = vand.u32 4294901760, %v3101_v43  ;;  %v2602_v52 = vand.u32 4294901760, %v2601_v41  ;;  %v11056_v14 = vpack.c.bf16 %v3108_v40, %v3101_v43 }
 0x1cb   : > { %v3110_v54 = vsub.f32 %v3108_v40, %v3109_v48 }
 0x1cc   : > { %v3103_v55 = vsub.f32 %v3101_v43, %v3102_v46  ;;  %v9794_v56 = vpack.c.bf16 %v2609_v45, %v2602_v52  ;;  %v11058_v5 = vpack.c.bf16 %v3109_v48, %v3102_v46 }
 0x1cd   : > { %v3111_v10 = vand.u32 4294901760, %v3110_v54 }
 0x1ce   : > { %9088 = vmatmul.mubr.f32.vlgmr.msra.gmra.mrb[2].mxu1 %v11013_v47  ;;  %v3104_v57 = vand.u32 4294901760, %v3103_v55 }
 0x1cf   : > { %9753 = vmatpush3.bf16.msra.mxu1 %v11028_v7  ;;  %9094 = vmatprep.mubr.f32.mxu1 %v10926_v60 }
 0x1d0   : > { %9755 = vmatprep.subr.bf16.mxu1 %v11025_v19  ;;  %v11064_v59 = vpack.c.bf16 %v3111_v10, %v3104_v57 }
 0x1d6   : > { %9095 = vmatmul.mubr.f32.vlgmr.msra.gmra.mrb[2].mxu1 %v11016_v50 }
 0x1d7   : > { %9757 = vmatpush3.bf16.msra.mxu1 %v11025_v19  ;;  %9101 = vmatprep.mubr.f32.mxu1 %v10934_v0 }
 0x1d8   : > { %9759 = vmatprep.subr.bf16.mxu1 %v11031_v27 }
 0x1de   : > { %9102 = vmatmul.mubr.f32.vlgmr.msra.gmra.mrb[2].mxu1 %v11019_v51 }
 0x1df   : > { %9761 = vmatpush3.bf16.msra.mxu1 %v11031_v27  ;;  %9108 = vmatprep.mubr.f32.mxu1 %v10921_v58 }
 0x1e0   : > { %9763 = vmatprep.subr.bf16.mxu1 %v11025_v19 }
 0x1e6   : > { %9109 = vmatmul.mubr.f32.vlgmr.msra.gmra.mrb[2].mxu1 %v11013_v47 }
 0x1e7   : > { %9765 = vmatpush3.bf16.msra.mxu1 %v11025_v19  ;;  %9115 = vmatprep.mubr.f32.mxu1 %v10921_v58 }
 0x1e8   : > { %9791 = vmatprep.subr.bf16.mxu1 %v11045_v34 }
 0x1ee   : > { %9116 = vmatmul.mubr.f32.vlgmr.msra.gmra.mrb[2].mxu1 %v11013_v47 }
 0x1ef   : > { %9793 = vmatpush3.bf16.msra.mxu1 %v11045_v34  ;;  %9182 = vmatprep.mubr.f32.mxu1 %v10946_v17 }
 0x1f0   : > { %9795 = vmatprep.subr.bf16.mxu1 %v9794_v56  ;;  %v9318_v61 = vpop.f32.mrb[8].mxu0 }
 0x1f1   : > { %v4134_v62 = vand.u32 4294901760, %v9318_v61  ;;  %v4108_v63 = vpop.f32.mrb[9].mxu0 }
 0x1f2   : > { %9183 = vmatmul.mubr.f32.vlgmr.msra.gmra.mrb[4].mxu1 %v11023_v4  ;;  %v4131_v1 = vand.u32 4294901760, %v4108_v63 }
 0x1f3   : > { %9797 = vmatpush3.bf16.msra.mxu1 %v9794_v56  ;;  %9189 = vmatprep.mubr.f32.mxu1 %v10921_v58  ;;  %v4226_v3 = vsub.f32 %v9318_v61, %v4134_v62 }
 0x1f4   : > { %9799 = vmatprep.subr.bf16.mxu1 %v11048_v38  ;;  %v11084_v6 = vpack.c.bf16 %v4134_v62, %v4131_v1  ;;  %v4219_v11 = vsub.f32 %v4108_v63, %v4131_v1  ;;  %v9321_v18 = vpop.f32.mrb[10].mxu0 }
 0x1f5   : > { %v4227_v8 = vand.u32 4294901760, %v4226_v3  ;;  %v4636_v19 = vand.u32 4294901760, %v9321_v18  ;;  %v4120_v15 = vpop.f32.mrb[11].mxu0 }
 0x1f6   : > { %v4220_v20 = vand.u32 4294901760, %v4219_v11  ;;  %v4633_v21 = vand.u32 4294901760, %v4120_v15  ;;  %v11086_v22 = vpack.c.bf16 %v4226_v3, %v4219_v11 }
 0x1f7   : > { %v4228_v23 = vsub.f32 %v4226_v3, %v4227_v8  ;;  %v4728_v2 = vsub.f32 %v9321_v18, %v4636_v19 }
 0x1f8   : > { %v4221_v7 = vsub.f32 %v4219_v11, %v4220_v20  ;;  %v11088_v24 = vpack.c.bf16 %v4636_v19, %v4633_v21  ;;  %v4721_v26 = vsub.f32 %v4120_v15, %v4633_v21  ;;  %v11090_v25 = vpack.c.bf16 %v4227_v8, %v4220_v20 }
 0x1f9   : > { %v4729_v27 = vand.u32 4294901760, %v4728_v2  ;;  %v4229_v28 = vand.u32 4294901760, %v4228_v23 }
 0x1fa   : > { %9190 = vmatmul.mubr.f32.vlgmr.msra.gmra.mrb[4].mxu1 %v11013_v47  ;;  %v4722_v29 = vand.u32 4294901760, %v4721_v26  ;;  %v4222_v30 = vand.u32 4294901760, %v4221_v7  ;;  %v11093_v31 = vpack.c.bf16 %v4728_v2, %v4721_v26 }
 0x1fb   : > { %9801 = vmatpush3.bf16.msra.mxu1 %v11048_v38  ;;  %9196 = vmatprep.mubr.f32.mxu1 %v10926_v60  ;;  %v4730_v9 = vsub.f32 %v4728_v2, %v4729_v27 }
 0x1fc   : > { %9803 = vmatprep.subr.bf16.mxu1 %v11045_v34  ;;  %v4723_v16 = vsub.f32 %v4721_v26, %v4722_v29  ;;  %v11098_v32 = vpack.c.bf16 %v4229_v28, %v4222_v30  ;;  %v11100_v33 = vpack.c.bf16 %v4729_v27, %v4722_v29 }
 0x1fd   : > { %v4731_v12 = vand.u32 4294901760, %v4730_v9 }
 0x1fe   : > { %v4724_v13 = vand.u32 4294901760, %v4723_v16 }
 0x200   : > { %v11102_v49 = vpack.c.bf16 %v4731_v12, %v4724_v13 }
 0x202   : > { %9197 = vmatmul.mubr.f32.vlgmr.msra.gmra.mrb[4].mxu1 %v11016_v50 }
 0x203   : > { %9805 = vmatpush3.bf16.msra.mxu1 %v11045_v34  ;;  %9203 = vmatprep.mubr.f32.mxu1 %v10934_v0 }
 0x204   : > { %9807 = vmatprep.subr.bf16.mxu1 %v11054_v44 }
 0x20a   : > { %9204 = vmatmul.mubr.f32.vlgmr.msra.gmra.mrb[4].mxu1 %v11019_v51 }
 0x20b   : > { %9809 = vmatpush3.bf16.msra.mxu1 %v11054_v44  ;;  %9210 = vmatprep.mubr.f32.mxu1 %v10921_v58 }
 0x20c   : > { %9811 = vmatprep.subr.bf16.mxu1 %v11045_v34 }
 0x212   : > { %9211 = vmatmul.mubr.f32.vlgmr.msra.gmra.mrb[4].mxu1 %v11013_v47 }
 0x213   : > { %9813 = vmatpush3.bf16.msra.mxu1 %v11045_v34  ;;  %9217 = vmatprep.mubr.f32.mxu1 %v10921_v58 }
 0x214   : > { %9815 = vmatprep.subr.bf16.mxu1 %v11051_v42 }
 0x21a   : > { %9218 = vmatmul.mubr.f32.vlgmr.msra.gmra.mrb[4].mxu1 %v11013_v47 }
 0x21b   : > { %9817 = vmatpush3.bf16.msra.mxu1 %v11051_v42  ;;  %9224 = vmatprep.mubr.f32.mxu1 %v10946_v17 }
 0x21c   : > { %9819 = vmatprep.subr.bf16.mxu1 %v11064_v59 }
 0x21e   : > { %9225 = vmatmul.mubr.f32.vlgmr.msra.gmra.mrb[6].mxu1 %v11023_v4 }
 0x21f   : > { %9821 = vmatpush3.bf16.msra.mxu1 %v11064_v59  ;;  %9231 = vmatprep.mubr.f32.mxu1 %v10921_v58 }
 0x220   : > { %9823 = vmatprep.subr.bf16.mxu1 %v11056_v14  ;;  %v9462_v34 = vpop.f32.mrb[12].mxu0 }
 0x221   : > { %v5746_v53 = vand.u32 4294901760, %v9462_v34  ;;  %v5720_v35 = vpop.f32.mrb[13].mxu0 }
 0x222   : > { %v5743_v36 = vand.u32 4294901760, %v5720_v35 }
 0x223   : > { %v5838_v37 = vsub.f32 %v9462_v34, %v5746_v53 }
 0x224   : > { %v11124_v38 = vpack.c.bf16 %v5746_v53, %v5743_v36  ;;  %v5831_v39 = vsub.f32 %v5720_v35, %v5743_v36  ;;  %v9465_v40 = vpop.f32.mrb[14].mxu0 }
 0x225   : > { %v5839_v41 = vand.u32 4294901760, %v5838_v37  ;;  %v6248_v43 = vand.u32 4294901760, %v9465_v40  ;;  %v5732_v44 = vpop.f32.mrb[15].mxu0 }
 0x226   : > { %9232 = vmatmul.mubr.f32.vlgmr.msra.gmra.mrb[6].mxu1 %v11013_v47  ;;  %v5832_v48 = vand.u32 4294901760, %v5831_v39  ;;  %v6245_v45 = vand.u32 4294901760, %v5732_v44  ;;  %v11127_v46 = vpack.c.bf16 %v5838_v37, %v5831_v39 }
 0x227   : > { %9825 = vmatpush3.bf16.msra.mxu1 %v11056_v14  ;;  %9238 = vmatprep.mubr.f32.mxu1 %v10926_v60  ;;  %v5840_v52 = vsub.f32 %v5838_v37, %v5839_v41  ;;  %v6340_v54 = vsub.f32 %v9465_v40, %v6248_v43 }
 0x228   : > { %9827 = vmatprep.subr.bf16.mxu1 %v11051_v42  ;;  %v5833_v55 = vsub.f32 %v5831_v39, %v5832_v48  ;;  %v11132_v56 = vpack.c.bf16 %v6248_v43, %v6245_v45  ;;  %v6333_v10 = vsub.f32 %v5732_v44, %v6245_v45  ;;  %v11134_v57 = vpack.c.bf16 %v5839_v41, %v5832_v48 }
 0x229   : > { %v6341_v59 = vand.u32 4294901760, %v6340_v54  ;;  %v5841_v61 = vand.u32 4294901760, %v5840_v52 }
 0x22a   : > { %v6334_v62 = vand.u32 4294901760, %v6333_v10  ;;  %v5834_v63 = vand.u32 4294901760, %v5833_v55  ;;  %v11136_v1 = vpack.c.bf16 %v6340_v54, %v6333_v10 }
 0x22b   : > { %v6342_v3 = vsub.f32 %v6340_v54, %v6341_v59 }
 0x22c   : > { %v6335_v14 = vsub.f32 %v6333_v10, %v6334_v62  ;;  %v11138_v11 = vpack.c.bf16 %v5841_v61, %v5834_v63  ;;  %v11140_v18 = vpack.c.bf16 %v6341_v59, %v6334_v62 }
 0x22d   : > { %v6343_v8 = vand.u32 4294901760, %v6342_v3 }
 0x22e   : > { %9239 = vmatmul.mubr.f32.vlgmr.msra.gmra.mrb[6].mxu1 %v11016_v50  ;;  %v6336_v19 = vand.u32 4294901760, %v6335_v14 }
 0x22f   : > { %9829 = vmatpush3.bf16.msra.mxu1 %v11051_v42  ;;  %9245 = vmatprep.mubr.f32.mxu1 %v10934_v0 }
 0x230   : > { %9831 = vmatprep.subr.bf16.mxu1 %v11058_v5  ;;  %v11146_v15 = vpack.c.bf16 %v6343_v8, %v6336_v19 }
 0x236   : > { %9246 = vmatmul.mubr.f32.vlgmr.msra.gmra.mrb[6].mxu1 %v11019_v51 }
 0x237   : > { %9833 = vmatpush3.bf16.msra.mxu1 %v11058_v5  ;;  %9252 = vmatprep.mubr.f32.mxu1 %v10921_v58 }
 0x238   : > { %9835 = vmatprep.subr.bf16.mxu1 %v11051_v42 }
 0x23e   : > { %9253 = vmatmul.mubr.f32.vlgmr.msra.gmra.mrb[6].mxu1 %v11013_v47 }
 0x23f   : > { %9837 = vmatpush3.bf16.msra.mxu1 %v11051_v42  ;;  %9259 = vmatprep.mubr.f32.mxu1 %v10921_v58 }
 0x240   : > { %9863 = vmatprep.subr.bf16.mxu1 %v11084_v6 }
 0x246   : > { %9260 = vmatmul.mubr.f32.vlgmr.msra.gmra.mrb[6].mxu1 %v11013_v47 }
 0x247   : > { %9865 = vmatpush3.bf16.msra.mxu1 %v11084_v6  ;;  %9326 = vmatprep.mubr.f32.mxu1 %v10946_v17 }
 0x248   : > { %9867 = vmatprep.subr.bf16.mxu1 %v11098_v32 }
 0x24a   : > { %9327 = vmatmul.mubr.f32.vlgmr.msra.gmra.mrb[8].mxu1 %v11023_v4 }
 0x24b   : > { %9869 = vmatpush3.bf16.msra.mxu1 %v11098_v32  ;;  %9333 = vmatprep.mubr.f32.mxu1 %v10921_v58 }
 0x24c   : > { %9871 = vmatprep.subr.bf16.mxu1 %v11086_v22 }
 0x250   : > { %v9606_v42 = vpop.f32.mrb[16].mxu0 }
 0x251   : > { %v7358_v5 = vand.u32 4294901760, %v9606_v42  ;;  %v7332_v20 = vpop.f32.mrb[17].mxu0 }
 0x252   : > { %9334 = vmatmul.mubr.f32.vlgmr.msra.gmra.mrb[8].mxu1 %v11013_v47  ;;  %v7355_v21 = vand.u32 4294901760, %v7332_v20 }
 0x253   : > { %9873 = vmatpush3.bf16.msra.mxu1 %v11086_v22  ;;  %9340 = vmatprep.mubr.f32.mxu1 %v10926_v60  ;;  %v7450_v23 = vsub.f32 %v9606_v42, %v7358_v5 }
 0x254   : > { %9875 = vmatprep.subr.bf16.mxu1 %v11084_v6  ;;  %v11168_v2 = vpack.c.bf16 %v7358_v5, %v7355_v21  ;;  %v7443_v7 = vsub.f32 %v7332_v20, %v7355_v21  ;;  %v9609_v26 = vpop.f32.mrb[18].mxu0 }
 0x255   : > { %v7451_v27 = vand.u32 4294901760, %v7450_v23  ;;  %v7860_v28 = vand.u32 4294901760, %v9609_v26  ;;  %v7344_v29 = vpop.f32.mrb[19].mxu0 }
 0x256   : > { %v7444_v30 = vand.u32 4294901760, %v7443_v7  ;;  %v7857_v9 = vand.u32 4294901760, %v7344_v29  ;;  %v11170_v16 = vpack.c.bf16 %v7450_v23, %v7443_v7 }
 0x257   : > { %v7452_v32 = vsub.f32 %v7450_v23, %v7451_v27  ;;  %v7952_v12 = vsub.f32 %v9609_v26, %v7860_v28 }
 0x258   : > { %v7445_v13 = vsub.f32 %v7443_v7, %v7444_v30  ;;  %v11172_v22 = vpack.c.bf16 %v7860_v28, %v7857_v9  ;;  %v7945_v34 = vsub.f32 %v7344_v29, %v7857_v9  ;;  %v11174_v53 = vpack.c.bf16 %v7451_v27, %v7444_v30 }
 0x259   : > { %v7953_v35 = vand.u32 4294901760, %v7952_v12  ;;  %v7453_v36 = vand.u32 4294901760, %v7452_v32 }
 0x25a   : > { %9341 = vmatmul.mubr.f32.vlgmr.msra.gmra.mrb[8].mxu1 %v11016_v50  ;;  %v7946_v37 = vand.u32 4294901760, %v7945_v34  ;;  %v7446_v39 = vand.u32 4294901760, %v7445_v13  ;;  %v11177_v40 = vpack.c.bf16 %v7952_v12, %v7945_v34 }
 0x25b   : > { %9877 = vmatpush3.bf16.msra.mxu1 %v11084_v6  ;;  %9347 = vmatprep.mubr.f32.mxu1 %v10934_v0  ;;  %v7954_v41 = vsub.f32 %v7952_v12, %v7953_v35 }
 0x25c   : > { %9879 = vmatprep.subr.bf16.mxu1 %v11090_v25  ;;  %v7947_v43 = vsub.f32 %v7945_v34, %v7946_v37  ;;  %v11182_v44 = vpack.c.bf16 %v7453_v36, %v7446_v39  ;;  %v11184_v48 = vpack.c.bf16 %v7953_v35, %v7946_v37 }
 0x25d   : > { %v7955_v45 = vand.u32 4294901760, %v7954_v41 }
 0x25e   : > { %v7948_v52 = vand.u32 4294901760, %v7947_v43 }
 0x260   : > { %v11186_v54 = vpack.c.bf16 %v7955_v45, %v7948_v52 }
 0x262   : > { %9348 = vmatmul.mubr.f32.vlgmr.msra.gmra.mrb[8].mxu1 %v11019_v51 }
 0x263   : > { %9881 = vmatpush3.bf16.msra.mxu1 %v11090_v25  ;;  %9354 = vmatprep.mubr.f32.mxu1 %v10921_v58 }
 0x264   : > { %9883 = vmatprep.subr.bf16.mxu1 %v11084_v6 }
 0x26a   : > { %9355 = vmatmul.mubr.f32.vlgmr.msra.gmra.mrb[8].mxu1 %v11013_v47 }
 0x26b   : > { %9885 = vmatpush3.bf16.msra.mxu1 %v11084_v6  ;;  %9361 = vmatprep.mubr.f32.mxu1 %v10921_v58 }
 0x26c   : > { %9887 = vmatprep.subr.bf16.mxu1 %v11088_v24 }
 0x272   : > { %9362 = vmatmul.mubr.f32.vlgmr.msra.gmra.mrb[8].mxu1 %v11013_v47 }
 0x273   : > { %9889 = vmatpush3.bf16.msra.mxu1 %v11088_v24  ;;  %9368 = vmatprep.mubr.f32.mxu1 %v10946_v17 }
 0x274   : > { %9891 = vmatprep.subr.bf16.mxu1 %v11102_v49 }
 0x276   : > { %9369 = vmatmul.mubr.f32.vlgmr.msra.gmra.mrb[10].mxu1 %v11023_v4 }
 0x277   : > { %9893 = vmatpush3.bf16.msra.mxu1 %v11102_v49  ;;  %9375 = vmatprep.mubr.f32.mxu1 %v10921_v58 }
 0x278   : > { %9895 = vmatprep.subr.bf16.mxu1 %v11093_v31 }
 0x27e   : > { %9376 = vmatmul.mubr.f32.vlgmr.msra.gmra.mrb[10].mxu1 %v11013_v47 }
 0x27f   : > { %9897 = vmatpush3.bf16.msra.mxu1 %v11093_v31  ;;  %9382 = vmatprep.mubr.f32.mxu1 %v10926_v60 }
 0x280   : > { %9899 = vmatprep.subr.bf16.mxu1 %v11088_v24 }
 0x286   : > { %9383 = vmatmul.mubr.f32.vlgmr.msra.gmra.mrb[10].mxu1 %v11016_v50 }
 0x287   : > { %9901 = vmatpush3.bf16.msra.mxu1 %v11088_v24  ;;  %9389 = vmatprep.mubr.f32.mxu1 %v10934_v0 }
 0x288   : > { %9903 = vmatprep.subr.bf16.mxu1 %v11100_v33 }
 0x28e   : > { %9390 = vmatmul.mubr.f32.vlgmr.msra.gmra.mrb[10].mxu1 %v11019_v51 }
 0x28f   : > { %9905 = vmatpush3.bf16.msra.mxu1 %v11100_v33  ;;  %9396 = vmatprep.mubr.f32.mxu1 %v10921_v58 }
 0x290   : > { %9907 = vmatprep.subr.bf16.mxu1 %v11088_v24 }
 0x295   : > { %v9075_v6 = vpop.f32.mrb[0].mxu1 }
 0x296   : > { %v1398_v25 = vpop.f32.mrb[1].mxu1  ;;  %9397 = vmatmul.mubr.f32.vlgmr.msra.gmra.mrb[10].mxu1 %v11013_v47  ;;  %v11268_v49 = vmul.f32 %v9075_v6, %v9075_v6 }
 0x297   : > { %9909 = vmatpush3.bf16.msra.mxu1 %v11088_v24  ;;  %9403 = vmatprep.mubr.f32.mxu1 %v10921_v58  ;;  %v11275_v10 = vmul.f32 %v1398_v25, %v1398_v25 }
 0x298   : > { %9935 = vmatprep.subr.bf16.mxu1 %v11124_v38 }
 0x29e   : > { %9404 = vmatmul.mubr.f32.vlgmr.msra.gmra.mrb[10].mxu1 %v11013_v47 }
 0x29f   : > { %9937 = vmatpush3.bf16.msra.mxu1 %v11124_v38  ;;  %9470 = vmatprep.mubr.f32.mxu1 %v10946_v17 }
 0x2a0   : > { %9939 = vmatprep.subr.bf16.mxu1 %v11138_v11 }
 0x2a2   : > { %9471 = vmatmul.mubr.f32.vlgmr.msra.gmra.mrb[12].mxu1 %v11023_v4 }
 0x2a3   : > { %9941 = vmatpush3.bf16.msra.mxu1 %v11138_v11  ;;  %9477 = vmatprep.mubr.f32.mxu1 %v10921_v58 }
 0x2a4   : > { %9943 = vmatprep.subr.bf16.mxu1 %v11127_v46 }
 0x2aa   : > { %9478 = vmatmul.mubr.f32.vlgmr.msra.gmra.mrb[12].mxu1 %v11013_v47 }
 0x2ab   : > { %9945 = vmatpush3.bf16.msra.mxu1 %v11127_v46  ;;  %9484 = vmatprep.mubr.f32.mxu1 %v10926_v60 }
 0x2ac   : > { %9947 = vmatprep.subr.bf16.mxu1 %v11124_v38 }
 0x2b2   : > { %9485 = vmatmul.mubr.f32.vlgmr.msra.gmra.mrb[12].mxu1 %v11016_v50 }
 0x2b3   : > { %9949 = vmatpush3.bf16.msra.mxu1 %v11124_v38  ;;  %9491 = vmatprep.mubr.f32.mxu1 %v10934_v0 }
 0x2b4   : > { %9951 = vmatprep.subr.bf16.mxu1 %v11134_v57 }
 0x2ba   : > { %9492 = vmatmul.mubr.f32.vlgmr.msra.gmra.mrb[12].mxu1 %v11019_v51 }
 0x2bb   : > { %9953 = vmatpush3.bf16.msra.mxu1 %v11134_v57  ;;  %9498 = vmatprep.mubr.f32.mxu1 %v10921_v58 }
 0x2bc   : > { %9955 = vmatprep.subr.bf16.mxu1 %v11124_v38 }
 0x2c1   : > { %v11240_v24 = vpop.f32.mrb[2].mxu1 }
 0x2c2   : > { %v11242_v31 = vpop.f32.mrb[3].mxu1  ;;  %9499 = vmatmul.mubr.f32.vlgmr.msra.gmra.mrb[12].mxu1 %v11013_v47  ;;  %v3517_v63 = vmul.f32 %v11240_v24, %v11240_v24 }
 0x2c3   : > { %9957 = vmatpush3.bf16.msra.mxu1 %v11124_v38  ;;  %9505 = vmatprep.mubr.f32.mxu1 %v10921_v58  ;;  %v3516_v11 = vmul.f32 %v11242_v31, %v11242_v31 }
 0x2c4   : > { %9959 = vmatprep.subr.bf16.mxu1 %v11132_v56 }
 0x2ca   : > { %9506 = vmatmul.mubr.f32.vlgmr.msra.gmra.mrb[12].mxu1 %v11013_v47 }
 0x2cb   : > { %9961 = vmatpush3.bf16.msra.mxu1 %v11132_v56  ;;  %9512 = vmatprep.mubr.f32.mxu1 %v10946_v17 }
 0x2cc   : > { %9963 = vmatprep.subr.bf16.mxu1 %v11146_v15 }
 0x2ce   : > { %9513 = vmatmul.mubr.f32.vlgmr.msra.gmra.mrb[14].mxu1 %v11023_v4 }
 0x2cf   : > { %9965 = vmatpush3.bf16.msra.mxu1 %v11146_v15  ;;  %9519 = vmatprep.mubr.f32.mxu1 %v10921_v58 }
 0x2d0   : > { %9967 = vmatprep.subr.bf16.mxu1 %v11136_v1 }
 0x2d6   : > { %9520 = vmatmul.mubr.f32.vlgmr.msra.gmra.mrb[14].mxu1 %v11013_v47 }
 0x2d7   : > { %9969 = vmatpush3.bf16.msra.mxu1 %v11136_v1  ;;  %9526 = vmatprep.mubr.f32.mxu1 %v10926_v60 }
 0x2d8   : > { %9971 = vmatprep.subr.bf16.mxu1 %v11132_v56 }
 0x2de   : > { %9527 = vmatmul.mubr.f32.vlgmr.msra.gmra.mrb[14].mxu1 %v11016_v50 }
 0x2df   : > { %9973 = vmatpush3.bf16.msra.mxu1 %v11132_v56  ;;  %9533 = vmatprep.mubr.f32.mxu1 %v10934_v0 }
 0x2e0   : > { %9975 = vmatprep.subr.bf16.mxu1 %v11140_v18 }
 0x2e6   : > { %9534 = vmatmul.mubr.f32.vlgmr.msra.gmra.mrb[14].mxu1 %v11019_v51 }
 0x2e7   : > { %9977 = vmatpush3.bf16.msra.mxu1 %v11140_v18  ;;  %9540 = vmatprep.mubr.f32.mxu1 %v10921_v58 }
 0x2e8   : > { %9979 = vmatprep.subr.bf16.mxu1 %v11132_v56 }
 0x2ed   : > { %v9219_v33 = vpop.f32.mrb[4].mxu1 }
 0x2ee   : > { %v11270_v38 = vmul.f32 %v9219_v33, %v9219_v33  ;;  %v11272_v46 = vmul.f32 %v9219_v33, %v9075_v6  ;;  %v3002_v55 = vpop.f32.mrb[5].mxu1  ;;  %9541 = vmatmul.mubr.f32.vlgmr.msra.gmra.mrb[14].mxu1 %v11013_v47 }
 0x2ef   : > { %v11277_v57 = vmul.f32 %v3002_v55, %v3002_v55  ;;  %v11279_v59 = vmul.f32 %v3002_v55, %v1398_v25  ;;  %9981 = vmatpush3.bf16.msra.mxu1 %v11132_v56  ;;  %9547 = vmatprep.mubr.f32.mxu1 %v10921_v58 }
 0x2f0   : > { %v11285_v61 = vadd.f32 %v11270_v38, %v11268_v49  ;;  %10007 = vmatprep.subr.bf16.mxu1 %v11168_v2  ;;  %v8363_v41 = vmul.f32 2.0, %v11272_v46 }
 0x2f1   : > { %v11290_v62 = vadd.f32 %v11277_v57, %v11275_v10 }
 0x2f2   : > { %v8387_v27 = vadd.f32 0.0001, %v11285_v61  ;;  %v8367_v6 = vadd.f32 0.0001, %v8363_v41 }
 0x2f3   : > { %v8386_v29 = vadd.f32 0.0001, %v11290_v62 }
 0x2f6   : > { %9548 = vmatmul.mubr.f32.vlgmr.msra.gmra.mrb[14].mxu1 %v11013_v47 }
 0x2f7   : > { %10009 = vmatpush3.bf16.msra.mxu1 %v11168_v2  ;;  %9614 = vmatprep.mubr.f32.mxu1 %v10946_v17 }
 0x2f8   : > { %10011 = vmatprep.subr.bf16.mxu1 %v11182_v44 }
 0x2fa   : > { %9615 = vmatmul.mubr.f32.vlgmr.msra.gmra.mrb[16].mxu1 %v11023_v4 }
 0x2fb   : > { %10013 = vmatpush3.bf16.msra.mxu1 %v11182_v44  ;;  %9621 = vmatprep.mubr.f32.mxu1 %v10921_v58 }
 0x2fc   : > { %10015 = vmatprep.subr.bf16.mxu1 %v11170_v16 }
 0x302   : > { %9622 = vmatmul.mubr.f32.vlgmr.msra.gmra.mrb[16].mxu1 %v11013_v47 }
 0x303   : > { %10017 = vmatpush3.bf16.msra.mxu1 %v11170_v16  ;;  %9628 = vmatprep.mubr.f32.mxu1 %v10926_v60 }
 0x304   : > { %10019 = vmatprep.subr.bf16.mxu1 %v11168_v2 }
 0x30a   : > { %9629 = vmatmul.mubr.f32.vlgmr.msra.gmra.mrb[16].mxu1 %v11016_v50 }
 0x30b   : > { %10021 = vmatpush3.bf16.msra.mxu1 %v11168_v2  ;;  %9635 = vmatprep.mubr.f32.mxu1 %v10934_v0 }
 0x30c   : > { %10023 = vmatprep.subr.bf16.mxu1 %v11174_v53 }
 0x312   : > { %9636 = vmatmul.mubr.f32.vlgmr.msra.gmra.mrb[16].mxu1 %v11019_v51 }
 0x313   : > { %10025 = vmatpush3.bf16.msra.mxu1 %v11174_v53  ;;  %9642 = vmatprep.mubr.f32.mxu1 %v10921_v58 }
 0x314   : > { %10027 = vmatprep.subr.bf16.mxu1 %v11168_v2 }
 0x319   : > { %v9261_v56 = vpop.f32.mrb[6].mxu1 }
 0x31a   : > { %v3521_v1 = vmul.f32 %v9261_v56, %v9261_v56  ;;  %v11315_v3 = vmul.f32 %v9261_v56, %v11240_v24  ;;  %v3504_v14 = vpop.f32.mrb[7].mxu1  ;;  %9643 = vmatmul.mubr.f32.vlgmr.msra.gmra.mrb[16].mxu1 %v11013_v47 }
 0x31b   : > { %v3520_v18 = vmul.f32 %v3504_v14, %v3504_v14  ;;  %v11321_v8 = vmul.f32 %v3504_v14, %v11242_v31  ;;  %10029 = vmatpush3.bf16.msra.mxu1 %v11168_v2  ;;  %9649 = vmatprep.mubr.f32.mxu1 %v10921_v58 }
 0x31c   : > { %v8385_v19 = vadd.f32 %v3521_v1, %v3517_v63  ;;  %10031 = vmatprep.subr.bf16.mxu1 %v11172_v22  ;;  %v8365_v56 = vmul.f32 2.0, %v11315_v3 }
 0x31d   : > { %v8384_v15 = vadd.f32 %v3520_v18, %v3516_v11  ;;  %v8364_v14 = vmul.f32 2.0, %v11321_v8 }
 0x31e   : > { %v8389_v34 = vadd.f32 0.0001, %v8385_v19 }
 0x31f   : > { %v8388_v35 = vadd.f32 0.0001, %v8384_v15  ;;  %v8369_v15 = vadd.f32 0.0001, %v8365_v56 }
 0x322   : > { %9650 = vmatmul.mubr.f32.vlgmr.msra.gmra.mrb[16].mxu1 %v11013_v47 }
 0x323   : > { %10033 = vmatpush3.bf16.msra.mxu1 %v11172_v22  ;;  %9656 = vmatprep.mubr.f32.mxu1 %v10946_v17 }
 0x324   : > { %10035 = vmatprep.subr.bf16.mxu1 %v11186_v54 }
 0x326   : > { %9657 = vmatmul.mubr.f32.vlgmr.msra.gmra.mrb[18].mxu1 %v11023_v4 }
 0x327   : > { %10037 = vmatpush3.bf16.msra.mxu1 %v11186_v54  ;;  %9663 = vmatprep.mubr.f32.mxu1 %v10921_v58 }
 0x328   : > { %10039 = vmatprep.subr.bf16.mxu1 %v11177_v40 }
 0x32e   : > { %9664 = vmatmul.mubr.f32.vlgmr.msra.gmra.mrb[18].mxu1 %v11013_v47 }
 0x32f   : > { %10041 = vmatpush3.bf16.msra.mxu1 %v11177_v40  ;;  %9670 = vmatprep.mubr.f32.mxu1 %v10926_v60 }
 0x330   : > { %10043 = vmatprep.subr.bf16.mxu1 %v11172_v22 }
 0x336   : > { %9671 = vmatmul.mubr.f32.vlgmr.msra.gmra.mrb[18].mxu1 %v11016_v50 }
 0x337   : > { %10045 = vmatpush3.bf16.msra.mxu1 %v11172_v22  ;;  %9677 = vmatprep.mubr.f32.mxu1 %v10934_v0 }
 0x338   : > { %10047 = vmatprep.subr.bf16.mxu1 %v11184_v48 }
 0x33e   : > { %9678 = vmatmul.mubr.f32.vlgmr.msra.gmra.mrb[18].mxu1 %v11019_v51 }
 0x33f   : > { %10049 = vmatpush3.bf16.msra.mxu1 %v11184_v48  ;;  %9684 = vmatprep.mubr.f32.mxu1 %v10921_v58  ;;  %v8362_v48 = vmul.f32 2.0, %v11279_v59 }
 0x340   : > { %10051 = vmatprep.subr.bf16.mxu1 %v11172_v22 }
 0x341   : > { %v8366_v24 = vadd.f32 0.0001, %v8362_v48 }
 0x345   : > { %v9363_v17 = vpop.f32.mrb[8].mxu1 }
 0x346   : > { %v5135_v60 = vsub.f32 %v9363_v17, %v11268_v49  ;;  %v4622_v4 = vpop.f32.mrb[9].mxu1  ;;  %9685 = vmatmul.mubr.f32.vlgmr.msra.gmra.mrb[18].mxu1 %v11013_v47 }
 0x347   : > { %v5134_v50 = vsub.f32 %v4622_v4, %v11275_v10  ;;  %10053 = vmatpush3.bf16.msra.mxu1 %v11172_v22  ;;  %9691 = vmatprep.mubr.f32.mxu1 %v10921_v58 }
 0x34e   : > { %9692 = vmatmul.mubr.f32.vlgmr.msra.gmra.mrb[18].mxu1 %v11013_v47 }
 0x371   : > { %v9405_v0 = vpop.f32.mrb[10].mxu1 }
 0x372   : > { %v5137_v51 = vsub.f32 %v9405_v0, %v3517_v63  ;;  %v5124_v42 = vpop.f32.mrb[11].mxu1 }
 0x373   : > { %v5136_v5 = vsub.f32 %v5124_v42, %v3516_v11 }
 0x39d   : > { %v9507_v20 = vpop.f32.mrb[12].mxu1 }
 0x39e   : > { %v6747_v21 = vsub.f32 %v9507_v20, %v11270_v38  ;;  %v6234_v23 = vpop.f32.mrb[13].mxu1 }
 0x39f   : > { %v6746_v2 = vsub.f32 %v6234_v23, %v11277_v57 }
 0x3a0   : > { %v8391_v7 = vadd.f32 %v6747_v21, %v5135_v60  ;;  %v8368_v60 = vadd.f32 0.0001, %v8364_v14 }
 0x3a1   : > { %v8390_v26 = vadd.f32 %v6746_v2, %v5134_v50 }
 0x3a2   : > { %v8395_v28 = vadd.f32 0.0009, %v8391_v7 }
 0x3a3   : > { %v8394_v58 = vadd.f32 0.0009, %v8390_v26 }
 0x3a4   : > { %v8399_v30 = vmul.f32 %v8395_v28, %v8387_v27 }
 0x3a5   : > { %v8398_v47 = vmul.f32 %v8394_v58, %v8386_v29 }
 0x3a6   : > { %10323 = vrcp.f32 %v8399_v30 }
 0x3a7   : > { %10325 = vrcp.f32 %v8398_v47 }
 0x3b0   : > { %v10324_v49 = vpop.eup %10323 }
 0x3b1   : > { %v10326_v55 = vpop.eup %10325 }
 0x3c9   : > { %v9549_v9 = vpop.f32.mrb[14].mxu1 }
 0x3ca   : > { %v6749_v16 = vsub.f32 %v9549_v9, %v3521_v1  ;;  %v6736_v32 = vpop.f32.mrb[15].mxu1 }
 0x3cb   : > { %v6748_v12 = vsub.f32 %v6736_v32, %v3520_v18 }
 0x3cc   : > { %v8393_v13 = vadd.f32 %v6749_v16, %v5137_v51 }
 0x3cd   : > { %v8392_v22 = vadd.f32 %v6748_v12, %v5136_v5 }
 0x3ce   : > { %v8397_v53 = vadd.f32 0.0009, %v8393_v13 }
 0x3cf   : > { %v8396_v36 = vadd.f32 0.0009, %v8392_v22 }
 0x3d0   : > { %v8401_v37 = vmul.f32 %v8397_v53, %v8389_v34 }
 0x3d1   : > { %v8400_v39 = vmul.f32 %v8396_v36, %v8388_v35 }
 0x3d2   : > { %10327 = vrcp.f32 %v8401_v37 }
 0x3d3   : > { %10329 = vrcp.f32 %v8400_v39 }
 0x3dc   : > { %v10328_v0 = vpop.eup %10327 }
 0x3dd   : > { %v10330_v42 = vpop.eup %10329 }
 0x3f5   : > { %v9651_v40 = vpop.f32.mrb[16].mxu1 }
 0x3f6   : > { %v8359_v43 = vsub.f32 %v9651_v40, %v11272_v46  ;;  %v7846_v44 = vpop.f32.mrb[17].mxu1 }
 0x3f7   : > { %v8358_v45 = vsub.f32 %v7846_v44, %v11279_v59 }
 0x3f8   : > { %v8371_v52 = vmul.f32 2.0, %v8359_v43 }
 0x3f9   : > { %v8370_v54 = vmul.f32 2.0, %v8358_v45 }
 0x3fa   : > { %v8375_v25 = vadd.f32 0.0009, %v8371_v52 }
 0x3fb   : > { %v8374_v31 = vadd.f32 0.0009, %v8370_v54 }
 0x3fc   : > { %v8379_v33 = vmul.f32 %v8375_v25, %v8367_v6 }
 0x3fd   : > { %v8378_v38 = vmul.f32 %v8374_v31, %v8366_v24 }
 0x3fe   : > { %v8405_v10 = vmul.f32 %v10324_v49, %v8379_v33 }
 0x3ff   : > { %v8403_v57 = vmul.f32 %v10326_v55, %v8378_v38 }
 0x400   : > { %v8411_v61 = vsel %vm299_vm0, %v8405_v10, 0.0 }
 0x401   : > { %v8410_v46 = vsel %vm299_vm0, %v8403_v57, 0.0 }
 0x402   : > { %v8412_v62 = vadd.f32 %v8411_v61, %v8410_v46 }
 0x421   : > { %v9693_v59 = vpop.f32.mrb[18].mxu1 }
 0x422   : > { %v8361_v63 = vsub.f32 %v9693_v59, %v11315_v3  ;;  %v8348_v1 = vpop.f32.mrb[19].mxu1 }
 0x423   : > { %v8360_v11 = vsub.f32 %v8348_v1, %v11321_v8 }
 0x424   : > { %v8373_v18 = vmul.f32 2.0, %v8361_v63 }
 0x425   : > { %v8372_v19 = vmul.f32 2.0, %v8360_v11 }
 0x426   : > { %v8377_v17 = vadd.f32 0.0009, %v8373_v18 }
 0x427   : > { %v8376_v4 = vadd.f32 0.0009, %v8372_v19 }
 0x428   : > { %v8381_v50 = vmul.f32 %v8377_v17, %v8369_v15 }
 0x429   : > { %v8380_v51 = vmul.f32 %v8376_v4, %v8368_v60 }
 0x42a   : > { %v8409_v5 = vmul.f32 %v10328_v0, %v8381_v50 }
 0x42b   : > { %v8407_v20 = vmul.f32 %v10330_v42, %v8380_v51 }
 0x42c   : > { %v8415_v23 = vsel %vm299_vm0, %v8409_v5, 0.0 }
 0x42d   : > { %v8413_v3 = vsel %vm299_vm0, %v8407_v20, 0.0 }
 0x42e   : > { %v8414_v21 = vadd.f32 %v8413_v3, %v8412_v62 }
 0x430   : > { %v8416_v8 = vadd.f32 %v8415_v23, %v8414_v21 }
 0x432   : > { %8417 = vadd.xlane.f32.xlu0 %v8416_v8 }
 0x4bf   : > { %v8418_v2 = vpop.xlane.xlu0 %8417 }
 0x4c0   : > { %v8419_v7 = vrot.slane %v8418_v2, 4 }
 0x4c2   : > { %v8420_v26 = vadd.f32 %v8419_v7, %v8418_v2 }
 0x4c4   : > { %v8421_v27 = vrot.slane %v8420_v26, 2 }
 0x4c6   : > { %v8422_v28 = vadd.f32 %v8421_v27, %v8420_v26 }
 0x4c8   : > { %v8423_v29 = vrot.slane %v8422_v28, 1 }
 0x4ca   : > { %v8424_v58 = vadd.f32 %v8423_v29, %v8422_v28 }
 0x4cc   : > { %10254 = vpush %v8424_v58 }
 0x4fd   : > { %s10255_s10 = spop %10254 }
 0x4fe   : > { %v8426_v30 = vstv %s10255_s10 }
 0x4ff   : > { %8428 = vst.msk [vmem:[%s286_s9] sm:$0x1] %vm8427_vm1, %v8426_v30 }
 0x500 PF: > { %p18_p12 = scmp.ge.s32.totalorder %s10625_s5, 6   ;;  %s11404_s15 = smov %s10485_s16 }
 0x501   : > { %s11405_s16 = smov %s10489_s17  ;;  %s11406_s17 = smov %s10636_s8 }
 0x502   : > { %s11407_s18 = smov %s10625_s5  ;;  %20 = sbr.rel (!%p18_p12) target bundleno = 6 (0x6), region = 97 }
 0x509   :  { %8446 = vsyncpa [#allocation3], 1 }
 0x50a   :  { %8448 = vsyncpa [#allocation3 + $0x1], 1 }
 0x50b   :  { %8449 = vsyncpa [#allocation5], 1 }
 0x50c   :  { %8451 = vsyncpa [#allocation5 + $0x1], 1 }
 0x50d   :  { %8452 = vsyncpa [#allocation8], 1 }

</bundles_post_ra>
